<compile_context>
chip_gen: v5e
topology: v5e:2x2
jax: 0.10.0
libtpu: 0.0.40
codegen_flags: <defaults>
</compile_context>

<pallas_src>
import functools

import jax
import jax.numpy as jnp
from jax.experimental import pallas as pl
from jax.experimental.pallas import tpu as pltpu


def _round_up(v, m):
    return ((v + m - 1) // m) * m


def _chip_defaults():
    """Generation-aware tiling / VMEM / dtype defaults."""
    kind = ""
    try:
        kind = jax.devices()[0].device_kind.lower()
    except Exception:
        pass
    if "v7" in kind:   # 2 TensorCores / chip, 64 MiB VMEM per TC
        return dict(num_cores=2, tile_n=2048,
                    vmem_limit_bytes=48 * 1024 * 1024,
                    stream_dtype=jnp.bfloat16)
    if "v6" in kind:   # 1 TensorCore, 128 MiB VMEM, bf16-native VPU
        return dict(num_cores=1, tile_n=4096,
                    vmem_limit_bytes=96 * 1024 * 1024,
                    stream_dtype=jnp.bfloat16)
    # v5e / older / unknown: 1 TensorCore, keep f32 streams (no bf16 VPU/EUP).
    return dict(num_cores=1, tile_n=4096,
                vmem_limit_bytes=64 * 1024 * 1024,
                stream_dtype=jnp.float32)


def _global_sa_kernel(batch_ref, feat_ref, w1_ref, w2_ref, p2_ref, out_ref):
    """One tile of TN points; accumulates per-graph max into this core's slab."""
    # out_ref ([1, B, H2p]) is resident across the inner ("arbitrary") grid
    # axis -> initialize once per core.
    @pl.when(pl.program_id(1) == 0)
    def _():
        out_ref[...] = jnp.full_like(out_ref, -jnp.inf)

    # Layer 1: single matmul of [x, pos, 1] against stacked [w1; b1] -> ReLU.
    # (BN1 has been folded into layer-2's weights in the wrapper.)
    a1 = jnp.dot(feat_ref[...], w1_ref[...],
                 preferred_element_type=jnp.float32)
    a1 = jnp.maximum(a1, 0.0)                                  # [TN, H1p] f32

    # Layer 2: Linear (BN1-folded) -> +b2 -> ReLU -> BN2 (eval, scale/shift).
    a2 = jnp.dot(a1.astype(w2_ref.dtype), w2_ref[...],
                 preferred_element_type=jnp.float32)
    a2 = jnp.maximum(a2 + p2_ref[0:1, :], 0.0)
    y2 = a2 * p2_ref[1:2, :] + p2_ref[2:3, :]                  # [TN, H2p] f32

    # Segment max: per-graph 2-D where+max reductions on a [1, B, H2p] carry.
    # (No [TN, B, H2p] temp, no dynamic-index stores.)
    ids = batch_ref[...]                                       # [TN, 1] int32
    nb = out_ref.shape[1]
    row_ids = jax.lax.broadcasted_iota(jnp.int32, (1, nb, 1), 1)  # hoisted

    def seg_body(b, acc):
        gmax = jnp.max(jnp.where(ids == b, y2, -jnp.inf),
                       axis=0, keepdims=True)                  # [1, H2p]
        upd = jnp.maximum(acc, gmax[None, :, :])               # [1, B, H2p]
        return jnp.where(row_ids == b, upd, acc)

    acc = out_ref[...]
    if nb <= 8:                       # small batch: unroll at trace time
        for b in range(nb):
            acc = seg_body(b, acc)
    else:                             # large batch: bounded live ranges
        acc = jax.lax.fori_loop(0, nb, seg_body, acc)
    out_ref[...] = acc


def _prepare_params(params, cx, stream_dtype):
    """Stack b1 under w1, fold BN1 into layer 2, pack (b2,s2,t2), pad to 128."""
    (w1, b1, s1, t1, w2, b2, s2, t2) = [jnp.asarray(p, jnp.float32) for p in params]
    cin, h1 = w1.shape
    h2 = w2.shape[1]
    assert cin == cx + 3
    h1p, h2p = _round_up(h1, 128), _round_up(h2, 128)

    # Exact BN1 fold: (relu(z)*s1 + t1) @ w2 + b2 == relu(z) @ (s1^T*w2) + (t1@w2 + b2)
    w2f = w2 * s1.reshape(h1, 1)
    b2f = b2 + t1 @ w2

    # Layer-1 weights with bias stacked as the last row (feat has a ones col).
    w1s = jnp.concatenate([w1, b1.reshape(1, h1)], axis=0)     # [cx+4, H1]
    w1s = jnp.pad(w1s, ((0, 0), (0, h1p - h1))).astype(stream_dtype)

    w2p = jnp.pad(w2f, ((0, h1p - h1), (0, h2p - h2))).astype(stream_dtype)

    pad_cols = lambda a: jnp.pad(a.reshape(1, -1), ((0, 0), (0, h2p - a.size)))
    p2 = jnp.concatenate([pad_cols(b2f), pad_cols(s2), pad_cols(t2)], axis=0)  # [3, H2p] f32
    return w1s, w2p, p2, h1p, h2p, h2


def global_sa_module(x, pos, batch, params, num_batches, *,
                     tile_n=None, num_cores=None, stream_dtype=None,
                     vmem_limit_bytes=None):
    """Pallas implementation of GlobalSAModule.forward.

    x:     [N, Cx] float32
    pos:   [N, 3]  float32
    batch: [N]     int32 (graph ids in [0, num_batches))
    """
    n, cx = x.shape
    assert pos.shape == (n, 3)

    d = _chip_defaults()
    tile_n = d["tile_n"] if tile_n is None else tile_n
    num_cores = d["num_cores"] if num_cores is None else num_cores
    stream_dtype = d["stream_dtype"] if stream_dtype is None else stream_dtype
    vmem_limit_bytes = (d["vmem_limit_bytes"] if vmem_limit_bytes is None
                        else vmem_limit_bytes)

    w1s, w2p, p2, h1p, h2p, h2 = _prepare_params(params, cx, stream_dtype)

    # Tiling: per-core point range, big tiles, pad N so every tile is full.
    per_core = -(-n // num_cores)
    tile_n_eff = _round_up(min(tile_n, _round_up(per_core, 8)), 8)
    n_pad = _round_up(n, tile_n_eff * num_cores)
    spc = n_pad // (tile_n_eff * num_cores)                    # steps per core

    # Single merged feature stream [x, pos, 1]; one matmul folds the b1 add.
    feat = jnp.concatenate([x, pos, jnp.ones((n, 1), x.dtype)], axis=1)  # [N, cx+4]
    batch = batch.astype(jnp.int32)
    pad_rows = n_pad - n
    if pad_rows:
        feat = jnp.pad(feat, ((0, pad_rows), (0, 0)))
        # Padded rows get an out-of-range graph id -> never selected.
        batch = jnp.pad(batch, ((0, pad_rows),), constant_values=num_batches)

    feat_s = feat.astype(stream_dtype)
    batch2d = batch.reshape(n_pad, 1)
    cf = cx + 4

    stream = lambda c_last: pl.BlockSpec((tile_n_eff, c_last),
                                         lambda c, i: (c * spc + i, 0))
    full = lambda shp: pl.BlockSpec(shp, lambda c, i: (0, 0))

    out_slabs = pl.pallas_call(
        _global_sa_kernel,
        out_shape=jax.ShapeDtypeStruct((num_cores, num_batches, h2p), jnp.float32),
        grid_spec=pltpu.PrefetchScalarGridSpec(
            num_scalar_prefetch=0,
            grid=(num_cores, spc),
            in_specs=[
                stream(1),                 # batch ids
                stream(cf),                # [x, pos, 1]
                full((cf, h1p)),           # [w1; b1]
                full((h1p, h2p)),          # BN1-folded w2
                full((3, h2p)),            # packed (b2, s2, t2)
            ],
            out_specs=pl.BlockSpec((1, num_batches, h2p), lambda c, i: (c, 0, 0)),
        ),
        compiler_params=pltpu.CompilerParams(
            dimension_semantics=("parallel", "arbitrary"),
            vmem_limit_bytes=vmem_limit_bytes),
    )(batch2d, feat_s, w1s, w2p, p2)

    # Tiny cross-core reduction + strip the lane padding.
    # Note: a graph with zero points stays at -inf (same as the previous
    # version); the original module assumes every graph has points.
    out = jnp.max(out_slabs, axis=0)[:, :h2]

    pos_out = jnp.zeros((num_batches, 3), dtype=pos.dtype)
    batch_out = jnp.arange(num_batches, dtype=batch.dtype)
    return out, pos_out, batch_out


def _make_params(key, c_in, h1, h2, eps=1e-5):
    """Deterministic synthetic parameters for MLP([c_in, h1, h2]) = 2x (Lin, ReLU, BN)."""
    ks = jax.random.split(key, 4)
    w1 = jax.random.normal(ks[0], (c_in, h1), jnp.float32) * 0.2
    b1 = jax.random.normal(ks[1], (1, h1), jnp.float32) * 0.1
    w2 = jax.random.normal(ks[2], (h1, h2), jnp.float32) * 0.2
    b2 = jax.random.normal(ks[3], (1, h2), jnp.float32) * 0.1

    def bn_fold(h, salt):
        gamma = 1.0 + 0.01 * jnp.arange(h, dtype=jnp.float32)
        beta = 0.05 * jnp.arange(h, dtype=jnp.float32) - 0.02 * salt
        run_mean = 0.03 * jnp.arange(h, dtype=jnp.float32)
        run_var = 1.0 + 0.02 * jnp.arange(h, dtype=jnp.float32)
        s = gamma / jnp.sqrt(run_var + eps)
        t = beta - run_mean * s
        return s.reshape(1, h), t.reshape(1, h)

    s1, t1 = bn_fold(h1, 1.0)
    s2, t2 = bn_fold(h2, 2.0)
    return (w1, b1, s1, t1, w2, b2, s2, t2)


def _reference(x, pos, batch, params, num_batches):
    (w1, b1, s1, t1, w2, b2, s2, t2) = params
    hp = jax.lax.Precision.HIGHEST
    xcat = jnp.concatenate([x, pos], axis=1)
    h = jnp.maximum(jnp.dot(xcat, w1, precision=hp) + b1, 0.0) * s1 + t1
    h = jnp.maximum(jnp.dot(h, w2, precision=hp) + b2, 0.0) * s2 + t2
    out = jnp.full((num_batches, h.shape[1]), -jnp.inf, jnp.float32)
    out = out.at[batch].max(h)
    return out


if __name__ == "__main__":
    key = jax.random.PRNGKey(0)
    k_x, k_pos, k_param = jax.random.split(key, 3)

    N, CX, B = 1024, 4, 2          # 1024 points, 4 features, 2 graphs
    H1, H2 = 32, 64                # MLP([4 + 3, 32, 64])

    x = jax.random.normal(k_x, (N, CX), jnp.float32)
    pos = jax.random.normal(k_pos, (N, 3), jnp.float32)
    batch = (jnp.arange(N) // (N // B)).astype(jnp.int32)

    params = _make_params(k_param, CX + 3, H1, H2)

    # tile_n=256 / num_cores=2 so the demo exercises multi-step accumulation
    # per core and the cross-slab max on any chip generation.  stream_dtype is
    # pinned to f32 so the tight tolerance below is dtype-independent.
    fn = jax.jit(functools.partial(global_sa_module, num_batches=B,
                                   tile_n=256, num_cores=2,
                                   stream_dtype=jnp.float32))
    x_out, pos_out, batch_out = fn(x, pos, batch, params)
    jax.block_until_ready((x_out, pos_out, batch_out))

    ref = _reference(x, pos, batch, params, B)
    assert x_out.shape == (B, H2)
    assert pos_out.shape == (B, 3)
    assert batch_out.shape == (B,)
    assert jnp.allclose(x_out, ref, atol=1e-3, rtol=1e-3), "mismatch vs reference"
    assert jnp.all(pos_out == 0)
    assert jnp.all(batch_out == jnp.arange(B))

    print("KERNEL_OK")
</pallas_src>

<mosaic_0001>
module attributes {stable_mosaic.version = 11 : i64} {
  func.func @_global_sa_kernel(%arg0: i32, %arg1: i32, %arg2: memref<256x1xi32, #tpu.memory_space<vmem>>, %arg3: memref<256x8xf32, #tpu.memory_space<vmem>>, %arg4: memref<8x128xf32, #tpu.memory_space<vmem>>, %arg5: memref<128x128xf32, #tpu.memory_space<vmem>>, %arg6: memref<3x128xf32, #tpu.memory_space<vmem>>, %arg7: memref<1x2x128xf32, #tpu.memory_space<vmem>>) attributes {dimension_semantics = [#tpu.dimension_semantics<parallel>, #tpu.dimension_semantics<arbitrary>], iteration_bounds = array<i64: 2, 2>, scalar_prefetch = 0 : i64, scratch_operands = 0 : i64, tpu.core_type = #tpu.core_type<tc>, window_params = [{transform_indices = @transform_0, window_bounds = array<i64: 256, 1>}, {transform_indices = @transform_1, window_bounds = array<i64: 256, 8>}, {pipeline_mode = #tpu.pipeline_mode<synchronous>, transform_indices = @transform_2, window_bounds = array<i64: 8, 128>}, {pipeline_mode = #tpu.pipeline_mode<synchronous>, transform_indices = @transform_3, window_bounds = array<i64: 128, 128>}, {pipeline_mode = #tpu.pipeline_mode<synchronous>, transform_indices = @transform_4, window_bounds = array<i64: 3, 128>}, {transform_indices = @transform_5, window_bounds = array<i64: 1, 2, 128>}]} {
    %c0_i32 = arith.constant 0 : i32
    %0 = arith.cmpi eq, %arg1, %c0_i32 : i32
    %1 = arith.extui %0 : i1 to i32
    %c0_i32_0 = arith.constant 0 : i32
    %2 = arith.cmpi ne, %1, %c0_i32_0 : i32
    scf.if %2 {
      %cst_28 = arith.constant 0xFF800000 : f32
      %57 = vector.broadcast %cst_28 : f32 to vector<1x2x128xf32>
      %c0_29 = arith.constant 0 : index
      %c0_30 = arith.constant 0 : index
      %c0_31 = arith.constant 0 : index
      %58 = vector.load %arg7[%c0_29, %c0_30, %c0_31] : memref<1x2x128xf32, #tpu.memory_space<vmem>>, vector<1x2x128xf32>
      tpu.vector_store %arg7[%c0_29, %c0_30, %c0_31], %57 {strides = array<i32>} : memref<1x2x128xf32, #tpu.memory_space<vmem>>, vector<1x2x128xf32>,
    } else {
    }
    %c0 = arith.constant 0 : index
    %c0_1 = arith.constant 0 : index
    %3 = vector.load %arg3[%c0, %c0_1] : memref<256x8xf32, #tpu.memory_space<vmem>>, vector<256x8xf32>
    %c0_2 = arith.constant 0 : index
    %c0_3 = arith.constant 0 : index
    %4 = vector.load %arg4[%c0_2, %c0_3] : memref<8x128xf32, #tpu.memory_space<vmem>>, vector<8x128xf32>
    %cst = arith.constant dense<0.000000e+00> : vector<256x128xf32>
    %5 = tpu.matmul %3, %4, %cst {dimension_numbers = #tpu.dot_dimension_numbers<[1], [0], [0], [1], [0, 0, 1, 1], [], []>} : vector<256x8xf32>, vector<8x128xf32>, vector<256x128xf32> -> vector<256x128xf32>
    %cst_4 = arith.constant 0.000000e+00 : f32
    %6 = vector.broadcast %cst_4 : f32 to vector<256x128xf32>
    %7 = arith.maximumf %5, %6 : vector<256x128xf32>
    %c0_5 = arith.constant 0 : index
    %c0_6 = arith.constant 0 : index
    %8 = vector.load %arg5[%c0_5, %c0_6] : memref<128x128xf32, #tpu.memory_space<vmem>>, vector<128x128xf32>
    %cst_7 = arith.constant dense<0.000000e+00> : vector<256x128xf32>
    %9 = tpu.matmul %7, %8, %cst_7 {dimension_numbers = #tpu.dot_dimension_numbers<[1], [0], [0], [1], [0, 0, 1, 1], [], []>} : vector<256x128xf32>, vector<128x128xf32>, vector<256x128xf32> -> vector<256x128xf32>
    %c0_8 = arith.constant 0 : index
    %c0_9 = arith.constant 0 : index
    %10 = vector.load %arg6[%c0_8, %c0_9] : memref<3x128xf32, #tpu.memory_space<vmem>>, vector<1x128xf32>
    %11 = vector.broadcast %10 : vector<1x128xf32> to vector<256x128xf32>
    %12 = arith.addf %9, %11 : vector<256x128xf32>
    %cst_10 = arith.constant 0.000000e+00 : f32
    %13 = vector.broadcast %cst_10 : f32 to vector<256x128xf32>
    %14 = arith.maximumf %12, %13 : vector<256x128xf32>
    %c1 = arith.constant 1 : index
    %c0_11 = arith.constant 0 : index
    %15 = vector.load %arg6[%c1, %c0_11] : memref<3x128xf32, #tpu.memory_space<vmem>>, vector<1x128xf32>
    %16 = vector.broadcast %15 : vector<1x128xf32> to vector<256x128xf32>
    %17 = arith.mulf %14, %16 : vector<256x128xf32>
    %c2 = arith.constant 2 : index
    %c0_12 = arith.constant 0 : index
    %18 = vector.load %arg6[%c2, %c0_12] : memref<3x128xf32, #tpu.memory_space<vmem>>, vector<1x128xf32>
    %19 = vector.broadcast %18 : vector<1x128xf32> to vector<256x128xf32>
    %20 = arith.addf %17, %19 : vector<256x128xf32>
    %c0_13 = arith.constant 0 : index
    %c0_14 = arith.constant 0 : index
    %21 = vector.load %arg2[%c0_13, %c0_14] : memref<256x1xi32, #tpu.memory_space<vmem>>, vector<256x1xi32>
    %22 = tpu.iota {dimensions = array<i32: 1>} : vector<1x2x1xi32>
    %c0_15 = arith.constant 0 : index
    %c0_16 = arith.constant 0 : index
    %c0_17 = arith.constant 0 : index
    %23 = vector.load %arg7[%c0_15, %c0_16, %c0_17] : memref<1x2x128xf32, #tpu.memory_space<vmem>>, vector<1x2x128xf32>
    %c0_i32_18 = arith.constant 0 : i32
    %24 = vector.broadcast %c0_i32_18 : i32 to vector<256x1xi32>
    %25 = arith.cmpi eq, %21, %24 : vector<256x1xi32>
    %cst_19 = arith.constant 0xFF800000 : f32
    %26 = vector.shape_cast %25 : vector<256x1xi1> to vector<256x1xi1>
    %27 = vector.broadcast %26 : vector<256x1xi1> to vector<256x128xi1>
    %28 = vector.broadcast %cst_19 : f32 to vector<256x128xf32>
    %29 = arith.select %27, %20, %28 : vector<256x128xi1>, vector<256x128xf32>
    %cst_20 = arith.constant dense<0xFF800000> : vector<128xf32>
    %30 = vector.multi_reduction <maximumf>, %29, %cst_20 [0] : vector<256x128xf32> to vector<128xf32>
    %31 = vector.shape_cast %30 : vector<128xf32> to vector<1x128xf32>
    %32 = vector.shape_cast %31 : vector<1x128xf32> to vector<1x1x128xf32>
    %33 = vector.broadcast %32 : vector<1x1x128xf32> to vector<1x2x128xf32>
    %34 = arith.maximumf %23, %33 : vector<1x2x128xf32>
    %c0_i32_21 = arith.constant 0 : i32
    %35 = vector.broadcast %c0_i32_21 : i32 to vector<1x2x1xi32>
    %36 = arith.cmpi eq, %22, %35 : vector<1x2x1xi32>
    %37 = vector.shape_cast %36 : vector<1x2x1xi1> to vector<1x2x1xi1>
    %38 = vector.broadcast %37 : vector<1x2x1xi1> to vector<1x2x128xi1>
    %39 = arith.select %38, %34, %23 : vector<1x2x128xi1>, vector<1x2x128xf32>
    %c1_i32 = arith.constant 1 : i32
    %40 = vector.broadcast %c1_i32 : i32 to vector<256x1xi32>
    %41 = arith.cmpi eq, %21, %40 : vector<256x1xi32>
    %cst_22 = arith.constant 0xFF800000 : f32
    %42 = vector.shape_cast %41 : vector<256x1xi1> to vector<256x1xi1>
    %43 = vector.broadcast %42 : vector<256x1xi1> to vector<256x128xi1>
    %44 = vector.broadcast %cst_22 : f32 to vector<256x128xf32>
    %45 = arith.select %43, %20, %44 : vector<256x128xi1>, vector<256x128xf32>
    %cst_23 = arith.constant dense<0xFF800000> : vector<128xf32>
    %46 = vector.multi_reduction <maximumf>, %45, %cst_23 [0] : vector<256x128xf32> to vector<128xf32>
    %47 = vector.shape_cast %46 : vector<128xf32> to vector<1x128xf32>
    %48 = vector.shape_cast %47 : vector<1x128xf32> to vector<1x1x128xf32>
    %49 = vector.broadcast %48 : vector<1x1x128xf32> to vector<1x2x128xf32>
    %50 = arith.maximumf %39, %49 : vector<1x2x128xf32>
    %c1_i32_24 = arith.constant 1 : i32
    %51 = vector.broadcast %c1_i32_24 : i32 to vector<1x2x1xi32>
    %52 = arith.cmpi eq, %22, %51 : vector<1x2x1xi32>
    %53 = vector.shape_cast %52 : vector<1x2x1xi1> to vector<1x2x1xi1>
    %54 = vector.broadcast %53 : vector<1x2x1xi1> to vector<1x2x128xi1>
    %55 = arith.select %54, %50, %39 : vector<1x2x128xi1>, vector<1x2x128xf32>
    %c0_25 = arith.constant 0 : index
    %c0_26 = arith.constant 0 : index
    %c0_27 = arith.constant 0 : index
    %56 = vector.load %arg7[%c0_25, %c0_26, %c0_27] : memref<1x2x128xf32, #tpu.memory_space<vmem>>, vector<1x2x128xf32>
    tpu.vector_store %arg7[%c0_25, %c0_26, %c0_27], %55 {strides = array<i32>} : memref<1x2x128xf32, #tpu.memory_space<vmem>>, vector<1x2x128xf32>,
    return
  }
  func.func @transform_0(%arg0: i32, %arg1: i32) -> (i32, i32) {
    %c2_i32 = arith.constant 2 : i32
    %0 = arith.muli %arg0, %c2_i32 : i32
    %1 = arith.addi %0, %arg1 : i32
    %c0_i32 = arith.constant 0 : i32
    %c0_i32_0 = arith.constant 0 : i32
    return %1, %c0_i32 : i32, i32
  }
  func.func @transform_1(%arg0: i32, %arg1: i32) -> (i32, i32) {
    %c2_i32 = arith.constant 2 : i32
    %0 = arith.muli %arg0, %c2_i32 : i32
    %1 = arith.addi %0, %arg1 : i32
    %c0_i32 = arith.constant 0 : i32
    %c0_i32_0 = arith.constant 0 : i32
    return %1, %c0_i32 : i32, i32
  }
  func.func @transform_2(%arg0: i32, %arg1: i32) -> (i32, i32) {
    %c0_i32 = arith.constant 0 : i32
    %c0_i32_0 = arith.constant 0 : i32
    %c0_i32_1 = arith.constant 0 : i32
    return %c0_i32, %c0_i32_0 : i32, i32
  }
  func.func @transform_3(%arg0: i32, %arg1: i32) -> (i32, i32) {
    %c0_i32 = arith.constant 0 : i32
    %c0_i32_0 = arith.constant 0 : i32
    %c0_i32_1 = arith.constant 0 : i32
    return %c0_i32, %c0_i32_0 : i32, i32
  }
  func.func @transform_4(%arg0: i32, %arg1: i32) -> (i32, i32) {
    %c0_i32 = arith.constant 0 : i32
    %c0_i32_0 = arith.constant 0 : i32
    %c0_i32_1 = arith.constant 0 : i32
    return %c0_i32, %c0_i32_0 : i32, i32
  }
  func.func @transform_5(%arg0: i32, %arg1: i32) -> (i32, i32, i32) {
    %c0_i32 = arith.constant 0 : i32
    %c0_i32_0 = arith.constant 0 : i32
    %c0_i32_1 = arith.constant 0 : i32
    return %arg0, %c0_i32, %c0_i32_0 : i32, i32, i32
  }
}

</mosaic_0001>

<bundles_post_ra>
// kernel: global_sa_module.1
= control target key start
LH: loop header
LB: loop body
LE: loop exit
PB: predicated region body
PF: predicated region fallthrough
CT: control target
= control target key end

     0   :  { %s1646_s18 = smov 0   ;;  %s1648_s19 = smov 0   ;;  %s2500_s0 = inlined_call_operand.vmem [shape: s32[1024,1], index: 0, kind: input, shape index: {}]   ;;  %s2501_s1 = inlined_call_operand.vmem [shape: f32[1024,8], index: 1, kind: input, shape index: {}]   ;;  %s2502_s2 = inlined_call_operand.vmem [shape: f32[8,128], index: 2, kind: input, shape index: {}]   ;;  %s2503_s3 = inlined_call_operand.vmem [shape: f32[128,128], index: 3, kind: input, shape index: {}]   ;;  %s2504_s4 = inlined_call_operand.vmem [shape: f32[3,128], index: 4, kind: input, shape index: {}]   ;;  %s2505_s5 = inlined_call_operand.vmem [shape: f32[2,2,128], index: 5, kind: output, shape index: {}]  }
   0x1   :  { %s1650_s20 = smov 0   ;;  %s1652_s21 = smov 0  }
   0x2   :  { %s1654_s22 = smov 0  }
   0x3 LB: > { %s24_s23 = sadd.s32 1, %s1604_s20  ;;  %s27_s24 = sadd.s32 1, %s1608_s21  ;;  %s1612_s22 = sphi %s1654_s22, %s15_s22   ;;  %s1608_s21 = sphi %s1652_s21, %s2509_s21   ;;  %s1604_s20 = sphi %s1650_s20, %s2508_s20   ;;  %s1600_s19 = sphi %s1648_s19, %s2507_s19   ;;  %s1596_s18 = sphi %s1646_s18, %s2506_s18  }
   0x4   : > { %p25_p0 = scmp.ge.s32.totalorder %s24_s23, 2  ;;  %p1450_p1 = scmp.ge.s32.totalorder %s1612_s22, 1 }
   0x5   : > { %p227_p2 = scmp.lt.s32.totalorder %s1612_s22, 5 }
   0x6   : > { %s2511_s23 = smov (%p25_p0, %s24_s23), 0  ;;  %s2513_s24 = smov (!%p25_p0, %s27_s24), %s1608_s21 }
   0x7   : > { %p228_p3 = pnand %p1450_p1, %p227_p2  ;;  %p29_p4 = scmp.ge.s32.totalorder %s2513_s24, 2 }
   0x8   : > { %s1451_s25 = sshll.u32 (!%p228_p3), %s1600_s19, 1  ;;  %p283_p5 = scmp.lt.s32.totalorder (!%p228_p3), %s1600_s19, 1 }
   0x9   : > { %s2515_s24 = smov (%p29_p4, %s2513_s24), 0  ;;  %231 = sbr.rel (%p228_p3) target bundleno = 544 (0x220), region = 40 }
   0xa   : > { %s264_s26 = sadd.s32 (!%p228_p3), %s1596_s18, %s1451_s25  ;;  %p1458_p7 = scmp.ne.s32.totalorder (!%p228_p3), %s1596_s18, 0 }
   0xb   : > { %s1452_s27 = sshll.u32 (!%p228_p3), %s264_s26, 5 }
   0xc   : > { %p266_p6 = scmp.lt.s32.totalorder (!%p228_p3), %s1452_s27, 127 }
   0xe   : > { %s2517_s19 = smov (!%p283_p5, %s1600_s19), 1  ;;  %s2519_s27 = smov (!%p266_p6, %s1452_s27), 127 }
   0xf   : > { %s1457_s28 = sshll.u32 %s2517_s19, 1  ;;  %s1453_s29 = sshll.u32 %s2519_s27, 3 }
  0x10   : > { %s1679_s7 = scalar_lea.vmem %s2505_s5, %s1457_s28  ;;  %s1684_s10 = scalar_lea.vmem %s2500_s0, %s1453_s29 }
  0x11   : > { %s1689_s13 = scalar_lea.vmem %s2501_s1, %s1453_s29  ;;  %290 = sbr.rel (%p1458_p7) target bundleno = 24 (0x18), region = 44 }
  0x16   : > { %v1614_v0 = vmov -inf  }
  0x17   : > { %291 = vst [vmem:[%s1679_s7] sm:$0x3] %v1614_v0 }
  0x18 PF: > { %v324_v1 = vld [vmem:[%s2502_s2] sm:$0xff]  ;;  %vm325_vm0 = vcmask 64512   ;;  %v310_v3 = vld [vmem:[%s1689_s13 + $0x90] sm:$0xff]  ;;  %v293_v4 = vld [vmem:[%s1689_s13 + $0x8] sm:$0xff]  ;;  %v1615_v7 = vmov 0  }
  0x19   : > { %v292_v2 = vld [vmem:[%s1689_s13] sm:$0xff]  ;;  %437 = vmatpush.msra.mxu0 %v324_v1  ;;  %1493 = vmatpush.msra.mxu3 %v324_v1  ;;  %v311_v5 = vld [vmem:[%s1689_s13 + $0x98] sm:$0xff]  ;;  %v294_v9 = vld [vmem:[%s1689_s13 + $0x10] sm:$0xff] }
  0x1a   : > { %1459 = vmatmul.msk.f32.vlgmr.msra.gmra.mxu0 %vm325_vm0, %v292_v2  ;;  %1477 = vmatmul.msk.f32.vlgmr.msra.gmra.mxu3 %vm325_vm0, %v310_v3  ;;  %v1704_v6 = vld [vmem:[%s1684_s10] sm:$0xff]  ;;  %v1716_v11 = vld [vmem:[%s1684_s10 + $0x8] sm:$0xff]  ;;  %v295_v13 = vld [vmem:[%s1689_s13 + $0x18] sm:$0xff] }
  0x1b   : > { %1568 = vset.pattern.permute.xlu0 %v1615_v7  ;;  %vm833_vm1 = vcmp.eq.s32.totalorder %v1704_v6, 0  ;;  %1569 = vset.pattern.permute.xlu1 %v1615_v7  ;;  %v312_v10 = vld [vmem:[%s1689_s13 + $0xa0] sm:$0xff]  ;;  %vm834_vm2 = vcmp.eq.s32.totalorder %v1716_v11, 0  ;;  %v313_v14 = vld [vmem:[%s1689_s13 + $0xa8] sm:$0xff]  ;;  %v1725_v15 = vld [vmem:[%s1684_s10 + $0x10] sm:$0xff] }
  0x1c   : > { %v865_v8 = vsel %vm833_vm1, 1, %v1615_v7  ;;  %1570 = vset.pattern.permute.xlu2 %v1615_v7  ;;  %v866_v12 = vsel %vm834_vm2, 1, %v1615_v7  ;;  %v1728_v16 = vld [vmem:[%s1684_s10 + $0x30] sm:$0xff]  ;;  %vm835_vm3 = vcmp.eq.s32.totalorder %v1725_v15, 0  ;;  %v296_v19 = vld [vmem:[%s1689_s13 + $0x20] sm:$0xff]  ;;  %v1739_v21 = vld [vmem:[%s1684_s10 + $0x18] sm:$0xff] }
  0x1d   : > { %898 = vperm.xlu0 %1568, %v865_v8   ;;  %vm839_vm4 = vcmp.eq.s32.totalorder %v1728_v16, 0  ;;  %v867_v17 = vsel %vm835_vm3, 1, %v1615_v7  ;;  %v314_v20 = vld [vmem:[%s1689_s13 + $0xb0] sm:$0xff]  ;;  %v1742_v22 = vld [vmem:[%s1684_s10 + $0x48] sm:$0xff]  ;;  %vm836_vm5 = vcmp.eq.s32.totalorder %v1739_v21, 0  ;;  %v315_v26 = vld [vmem:[%s1689_s13 + $0xb8] sm:$0xff] }
  0x1e   : > { %v871_v18 = vsel %vm839_vm4, 1, %v1615_v7  ;;  %904 = vperm.xlu1 %1569, %v867_v17   ;;  %vm842_vm6 = vcmp.eq.s32.totalorder %v1742_v22, 0  ;;  %v868_v23 = vsel %vm836_vm5, 1, %v1615_v7  ;;  %v297_v25 = vld [vmem:[%s1689_s13 + $0x28] sm:$0xff]  ;;  %v1753_v27 = vld [vmem:[%s1684_s10 + $0x38] sm:$0xff]  ;;  %v1756_v28 = vld [vmem:[%s1684_s10 + $0x60] sm:$0xff] }
  0x1f   : > { %v874_v24 = vsel %vm842_vm6, 1, %v1615_v7  ;;  %vm840_vm7 = vcmp.eq.s32.totalorder %v1753_v27, 0  ;;  %vm845_vm8 = vcmp.eq.s32.totalorder %v1756_v28, 0  ;;  %v298_v31 = vld [vmem:[%s1689_s13 + $0x30] sm:$0xff]  ;;  %v316_v32 = vld [vmem:[%s1689_s13 + $0xc0] sm:$0xff]  ;;  %v1773_v35 = vld [vmem:[%s1684_s10 + $0x78] sm:$0xff] }
  0x20   : > { %v872_v29 = vsel %vm840_vm7, 1, %v1615_v7  ;;  %v877_v30 = vsel %vm845_vm8, 1, %v1615_v7  ;;  %v1767_v33 = vld [vmem:[%s1684_s10 + $0x20] sm:$0xff]  ;;  %v1770_v34 = vld [vmem:[%s1684_s10 + $0x50] sm:$0xff]  ;;  %vm848_vm11 = vcmp.eq.s32.totalorder %v1773_v35, 0  ;;  %v299_v39 = vld [vmem:[%s1689_s13 + $0x38] sm:$0xff] }
  0x21   : > { %vm837_vm9 = vcmp.eq.s32.totalorder %v1767_v33, 0  ;;  %vm843_vm10 = vcmp.eq.s32.totalorder %v1770_v34, 0  ;;  %v880_v38 = vsel %vm848_vm11, 1, %v1615_v7  ;;  %v317_v40 = vld [vmem:[%s1689_s13 + $0xc8] sm:$0xff]  ;;  %v1792_v43 = vld [vmem:[%s1684_s10 + $0x90] sm:$0xff]  ;;  %v300_v47 = vld [vmem:[%s1689_s13 + $0x40] sm:$0xff] }
  0x22   : > { %1460 = vmatmul.msk.f32.gmra.mxu0 %vm325_vm0, %v293_v4  ;;  %1478 = vmatmul.msk.f32.gmra.mxu3 %vm325_vm0, %v311_v5  ;;  %v869_v36 = vsel %vm837_vm9, 1, %v1615_v7  ;;  %v875_v37 = vsel %vm843_vm10, 1, %v1615_v7  ;;  %v1786_v41 = vld [vmem:[%s1684_s10 + $0x28] sm:$0xff]  ;;  %vm851_vm14 = vcmp.eq.s32.totalorder %v1792_v43, 0  ;;  %v318_v48 = vld [vmem:[%s1689_s13 + $0xd0] sm:$0xff]  ;;  %v582_v49 = vld [vmem:[%s2503_s3 + $0x78] sm:$0xff] }
  0x23   : > { %910 = vperm.xlu2 %1570, %v869_v36   ;;  %v1789_v42 = vld [vmem:[%s1684_s10 + $0x68] sm:$0xff]  ;;  %vm838_vm12 = vcmp.eq.s32.totalorder %v1786_v41, 0  ;;  %v883_v46 = vsel %vm851_vm14, 1, %v1615_v7  ;;  %v1808_v50 = vld [vmem:[%s1684_s10 + $0x40] sm:$0xff]  ;;  %585 = vmatpush.msra.mxu1 %v582_v49  ;;  %v581_v53 = vld [vmem:[%s2503_s3 + $0x70] sm:$0xff] }
  0x24   : > { %vm846_vm13 = vcmp.eq.s32.totalorder %v1789_v42, 0  ;;  %v870_v44 = vsel %vm838_vm12, 1, %v1615_v7  ;;  %v1811_v51 = vld [vmem:[%s1684_s10 + $0x80] sm:$0xff]  ;;  %vm841_vm15 = vcmp.eq.s32.totalorder %v1808_v50, 0  ;;  %v1816_v52 = vld [vmem:[%s1684_s10 + $0xa8] sm:$0xff]  ;;  %1495 = vmatpush.msrb.mxu3 %v582_v49  ;;  %1494 = vmatpush.msra.mxu2 %v582_v49  ;;  %v319_v59 = vld [vmem:[%s1689_s13 + $0xd8] sm:$0xff] }
  0x25   : > { %901 = vperm.xlu0 %1568, %v866_v12   ;;  %v878_v45 = vsel %vm846_vm13, 1, %v1615_v7  ;;  %vm849_vm1 = vcmp.eq.s32.totalorder %v1811_v51, 0  ;;  %v873_v54 = vsel %vm841_vm15, 1, %v1615_v7  ;;  %vm854_vm2 = vcmp.eq.s32.totalorder %v1816_v52, 0  ;;  %v580_v57 = vld [vmem:[%s2503_s3 + $0x68] sm:$0xff]  ;;  %586 = vmatpush.msra.mxu1 %v581_v53  ;;  %v579_v60 = vld [vmem:[%s2503_s3 + $0x60] sm:$0xff] }
  0x26   : > { %907 = vperm.xlu1 %1569, %v868_v23   ;;  %v881_v55 = vsel %vm849_vm1, 1, %v1615_v7  ;;  %v886_v56 = vsel %vm854_vm2, 1, %v1615_v7  ;;  %v301_v58 = vld [vmem:[%s1689_s13 + $0x48] sm:$0xff]  ;;  %1497 = vmatpush.msrb.mxu3 %v581_v53  ;;  %v578_v61 = vld [vmem:[%s2503_s3 + $0x58] sm:$0xff]  ;;  %v1847_v0 = vld [vmem:[%s1684_s10 + $0xc0] sm:$0xff]  ;;  %vm1100_vm12 = vcmp.eq.s32.totalorder %v1716_v11, 1 }
  0x27   : > { %1496 = vmatpush.msra.mxu2 %v581_v53  ;;  %587 = vmatpush.msra.mxu1 %v580_v57  ;;  %v1839_v62 = vld [vmem:[%s1684_s10 + $0x58] sm:$0xff]  ;;  %vm857_vm5 = vcmp.eq.s32.totalorder %v1847_v0, 0  ;;  %v577_v3 = vld [vmem:[%s2503_s3 + $0x50] sm:$0xff]  ;;  %v576_v5 = vld [vmem:[%s2503_s3 + $0x48] sm:$0xff]  ;;  %v1132_v53 = vsel %vm1100_vm12, 1, %v1615_v7  ;;  %vm1103_vm15 = vcmp.eq.s32.totalorder %v1767_v33, 1 }
  0x28   : > { %1499 = vmatpush.msrb.mxu3 %v580_v57  ;;  %v1842_v63 = vld [vmem:[%s1684_s10 + $0x98] sm:$0xff]  ;;  %vm844_vm3 = vcmp.eq.s32.totalorder %v1839_v62, 0  ;;  %v889_v4 = vsel %vm857_vm5, 1, %v1615_v7  ;;  %v302_v8 = vld [vmem:[%s1689_s13 + $0x50] sm:$0xff]  ;;  %v1932_v49 = vld [vmem:[%s1684_s10 + $0xe0] sm:$0xff]  ;;  %vm1110_vm12 = vcmp.eq.s32.totalorder %v1839_v62, 1 }
  0x29   : > { %1498 = vmatpush.msra.mxu2 %v580_v57  ;;  %588 = vmatpush.msra.mxu1 %v579_v60  ;;  %vm852_vm4 = vcmp.eq.s32.totalorder %v1842_v63, 0  ;;  %v876_v1 = vsel %vm844_vm3, 1, %v1615_v7  ;;  %v574_v12 = vld [vmem:[%s2503_s3 + $0x38] sm:$0xff]  ;;  %v1909_v36 = vld [vmem:[%s1684_s10 + $0xf0] sm:$0xff]  ;;  %vm861_vm14 = vcmp.eq.s32.totalorder %v1932_v49, 0  ;;  %v305_v11 = vld [vmem:[%s1689_s13 + $0x68] sm:$0xff] }
  0x2a   : > { %1461 = vmatmul.msk.f32.gmra.mxu0 %vm325_vm0, %v294_v9  ;;  %1479 = vmatmul.msk.f32.gmra.mxu3 %vm325_vm0, %v312_v10  ;;  %v884_v2 = vsel %vm852_vm4, 1, %v1615_v7  ;;  %v320_v9 = vld [vmem:[%s1689_s13 + $0xe0] sm:$0xff]  ;;  %v1878_v17 = vld [vmem:[%s1684_s10 + $0xd8] sm:$0xff]  ;;  %vm863_vm11 = vcmp.eq.s32.totalorder %v1909_v36, 0  ;;  %v1959_v33 = vld [vmem:[%s1684_s10 + $0xd0] sm:$0xff]  ;;  %vm1101_vm3 = vcmp.eq.s32.totalorder %v1725_v15, 1 }
  0x2b   : > { %913 = vperm.xlu2 %1570, %v870_v44   ;;  %1501 = vmatpush.msrb.mxu3 %v579_v60  ;;  %v575_v10 = vld [vmem:[%s2503_s3 + $0x40] sm:$0xff]  ;;  %vm860_vm8 = vcmp.eq.s32.totalorder %v1878_v17, 0  ;;  %v568_v44 = vld [vmem:[%s2503_s3 + $0x8] sm:$0xff]  ;;  %v1945_v57 = vld [vmem:[%s1684_s10 + $0xb8] sm:$0xff]  ;;  %vm1106_vm4 = vcmp.eq.s32.totalorder %v1753_v27, 1  ;;  %vm859_vm5 = vcmp.eq.s32.totalorder %v1959_v33, 0 }
  0x2c   : > { %1500 = vmatpush.msra.mxu2 %v579_v60  ;;  %589 = vmatpush.msra.mxu1 %v578_v61  ;;  %v892_v23 = vsel %vm860_vm8, 1, %v1615_v7  ;;  %vm856_vm1 = vcmp.eq.s32.totalorder %v1945_v57, 0 }
  0x2d   : > { %916 = vperm.xlu0 %1568, %v871_v18   ;;  %1503 = vmatpush.msrb.mxu3 %v578_v61  ;;  %v888_v60 = vsel %vm856_vm1, 1, %v1615_v7  ;;  %vm1118_vm1 = vcmp.eq.s32.totalorder %v1842_v63, 1 }
  0x2e   : > { %919 = vperm.xlu1 %1569, %v872_v29   ;;  %590 = vmatpush.msra.mxu1 %v577_v3  ;;  %v571_v29 = vld [vmem:[%s2503_s3 + $0x20] sm:$0xff]  ;;  %v1150_v62 = vsel %vm1118_vm1, 1, %v1615_v7  ;;  %vm1126_vm1 = vcmp.eq.s32.totalorder %v1878_v17, 1 }
  0x2f   : > { %1502 = vmatpush.msra.mxu2 %v578_v61  ;;  %1505 = vmatpush.msrb.mxu3 %v577_v3 }
  0x30   : > { %591 = vmatpush.msra.mxu1 %v576_v5 }
  0x31   : > { %1507 = vmatpush.msrb.mxu3 %v576_v5  ;;  %1504 = vmatpush.msra.mxu2 %v577_v3  ;;  %v1138_v3 = vsel %vm1106_vm4, 1, %v1615_v7 }
  0x32   : > { %1462 = vmatmul.msk.f32.gmra.mxu0 %vm325_vm0, %v295_v13  ;;  %1480 = vmatmul.msk.f32.gmra.mxu3 %vm325_vm0, %v313_v14  ;;  %v1870_v13 = vld [vmem:[%s1684_s10 + $0x70] sm:$0xff] }
  0x33   : > { %922 = vperm.xlu2 %1570, %v873_v54   ;;  %v1873_v14 = vld [vmem:[%s1684_s10 + $0xb0] sm:$0xff]  ;;  %592 = vmatpush.msra.mxu1 %v575_v10  ;;  %vm847_vm6 = vcmp.eq.s32.totalorder %v1870_v13, 0 }
  0x34   : > { %vm855_vm7 = vcmp.eq.s32.totalorder %v1873_v14, 0  ;;  %v879_v18 = vsel %vm847_vm6, 1, %v1615_v7  ;;  %1509 = vmatpush.msrb.mxu3 %v575_v10  ;;  %1506 = vmatpush.msra.mxu2 %v576_v5  ;;  %v307_v5 = vld [vmem:[%s1689_s13 + $0x78] sm:$0xff]  ;;  %vm1104_vm6 = vcmp.eq.s32.totalorder %v1786_v41, 1  ;;  %vm1121_vm4 = vcmp.eq.s32.totalorder %v1873_v14, 1 }
  0x35   : > { %925 = vperm.xlu0 %1568, %v874_v24   ;;  %593 = vmatpush.msra.mxu1 %v574_v12  ;;  %v572_v24 = vld [vmem:[%s2503_s3 + $0x28] sm:$0xff]  ;;  %v1136_v15 = vsel %vm1104_vm6, 1, %v1615_v7  ;;  %vm1111_vm6 = vcmp.eq.s32.totalorder %v1756_v28, 1 }
  0x36   : > { %928 = vperm.xlu1 %1569, %v875_v37   ;;  %1511 = vmatpush.msrb.mxu3 %v574_v12  ;;  %v1143_v14 = vsel %vm1111_vm6, 1, %v1615_v7 }
  0x37   : > { %1508 = vmatpush.msra.mxu2 %v575_v10 }
  0x39   : > { %1510 = vmatpush.msra.mxu2 %v574_v12  ;;  %v308_v12 = vld [vmem:[%s1689_s13 + $0x80] sm:$0xff] }
  0x3a   : > { %1463 = vmatmul.msk.f32.gmra.mxu0 %vm325_vm0, %v296_v19  ;;  %1481 = vmatmul.msk.f32.gmra.mxu3 %vm325_vm0, %v314_v20  ;;  %v887_v19 = vsel %vm855_vm7, 1, %v1615_v7  ;;  %v573_v20 = vld [vmem:[%s2503_s3 + $0x30] sm:$0xff]  ;;  %vm1109_vm7 = vcmp.eq.s32.totalorder %v1770_v34, 1 }
  0x3b   : > { %931 = vperm.xlu2 %1570, %v876_v1   ;;  %594 = vmatpush.msra.mxu1 %v573_v20  ;;  %v306_v1 = vld [vmem:[%s1689_s13 + $0x70] sm:$0xff]  ;;  %v1141_v27 = vsel %vm1109_vm7, 1, %v1615_v7 }
  0x3c   : > { %1513 = vmatpush.msrb.mxu3 %v573_v20  ;;  %1512 = vmatpush.msra.mxu2 %v573_v20 }
  0x3d   : > { %934 = vperm.xlu0 %1568, %v877_v30   ;;  %595 = vmatpush.msra.mxu1 %v572_v24  ;;  %v570_v30 = vld [vmem:[%s2503_s3 + $0x18] sm:$0xff] }
  0x3e   : > { %937 = vperm.xlu1 %1569, %v878_v45   ;;  %v304_v45 = vld [vmem:[%s1689_s13 + $0x60] sm:$0xff]  ;;  %1515 = vmatpush.msrb.mxu3 %v572_v24 }
  0x3f   : > { %596 = vmatpush.msra.mxu1 %v571_v29  ;;  %1514 = vmatpush.msra.mxu2 %v572_v24  ;;  %v309_v24 = vld [vmem:[%s1689_s13 + $0x88] sm:$0xff] }
  0x40   : > { %1517 = vmatpush.msrb.mxu3 %v571_v29 }
  0x41   : > { %597 = vmatpush.msra.mxu1 %v570_v30  ;;  %1516 = vmatpush.msra.mxu2 %v571_v29 }
  0x42   : > { %1464 = vmatmul.msk.f32.gmra.mxu0 %vm325_vm0, %v297_v25  ;;  %1482 = vmatmul.msk.f32.gmra.mxu3 %vm325_vm0, %v315_v26  ;;  %v303_v25 = vld [vmem:[%s1689_s13 + $0x58] sm:$0xff]  ;;  %v321_v26 = vld [vmem:[%s1689_s13 + $0xe8] sm:$0xff] }
  0x43   : > { %940 = vperm.xlu2 %1570, %v879_v18   ;;  %1519 = vmatpush.msrb.mxu3 %v570_v30 }
  0x44   : > { %1518 = vmatpush.msra.mxu2 %v570_v30 }
  0x45   : > { %943 = vperm.xlu0 %1568, %v880_v38  }
  0x46   : > { %946 = vperm.xlu1 %1569, %v881_v55   ;;  %v893_v55 = vsel %vm861_vm14, 1, %v1615_v7  ;;  %vm1115_vm14 = vcmp.eq.s32.totalorder %v1811_v51, 1 }
  0x4a   : > { %1465 = vmatmul.msk.f32.gmra.mxu0 %vm325_vm0, %v298_v31  ;;  %1483 = vmatmul.msk.f32.gmra.mxu3 %vm325_vm0, %v316_v32  ;;  %v1901_v31 = vld [vmem:[%s1684_s10 + $0x88] sm:$0xff] }
  0x4b   : > { %v1904_v32 = vld [vmem:[%s1684_s10 + $0xc8] sm:$0xff]  ;;  %vm850_vm9 = vcmp.eq.s32.totalorder %v1901_v31, 0 }
  0x4c   : > { %vm858_vm10 = vcmp.eq.s32.totalorder %v1904_v32, 0  ;;  %v882_v37 = vsel %vm850_vm9, 1, %v1615_v7  ;;  %vm1107_vm9 = vcmp.eq.s32.totalorder %v1808_v50, 1  ;;  %v1147_v50 = vsel %vm1115_vm14, 1, %v1615_v7 }
  0x4d   : > { %952 = vperm.xlu0 %1568, %v883_v46   ;;  %v890_v38 = vsel %vm858_vm10, 1, %v1615_v7  ;;  %949 = vperm.xlu2 %1570, %v882_v37   ;;  %v322_v46 = vld [vmem:[%s1689_s13 + $0xf0] sm:$0xff]  ;;  %vm1099_vm10 = vcmp.eq.s32.totalorder %v1704_v6, 1  ;;  %v1139_v34 = vsel %vm1107_vm9, 1, %v1615_v7  ;;  %v1142_v6 = vsel %vm1110_vm12, 1, %v1615_v7 }
  0x4e   : > { %955 = vperm.xlu1 %1569, %v884_v2   ;;  %v1133_v2 = vsel %vm1101_vm3, 1, %v1615_v7  ;;  %v1131_v41 = vsel %vm1099_vm10, 1, %v1615_v7  ;;  %vm1108_vm3 = vcmp.eq.s32.totalorder %v1742_v22, 1  ;;  %vm1124_vm7 = vcmp.eq.s32.totalorder %v1904_v32, 1 }
  0x4f   : > { %v1140_v63 = vsel %vm1108_vm3, 1, %v1615_v7  ;;  %vm1114_vm9 = vcmp.eq.s32.totalorder %v1773_v35, 1  ;;  %vm1127_vm10 = vcmp.eq.s32.totalorder %v1932_v49, 1  ;;  %vm1117_vm12 = vcmp.eq.s32.totalorder %v1792_v43, 1 }
  0x50   : > { %v1146_v32 = vsel %vm1114_vm9, 1, %v1615_v7  ;;  %v1149_v49 = vsel %vm1117_vm12, 1, %v1615_v7 }
  0x52   : > { %1466 = vmatmul.msk.f32.gmra.mxu0 %vm325_vm0, %v299_v39  ;;  %1484 = vmatmul.msk.f32.gmra.mxu3 %vm325_vm0, %v317_v40  ;;  %v569_v39 = vld [vmem:[%s2503_s3 + $0x10] sm:$0xff]  ;;  %v895_v40 = vsel %vm863_vm11, 1, %v1615_v7  ;;  %vm1112_vm11 = vcmp.eq.s32.totalorder %v1789_v42, 1 }
  0x53   : > { %598 = vmatpush.msra.mxu1 %v569_v39  ;;  %1521 = vmatpush.msrb.mxu3 %v569_v39 }
  0x54   : > { %1520 = vmatpush.msra.mxu2 %v569_v39 }
  0x55   : > { %961 = vperm.xlu0 %1568, %v886_v56   ;;  %599 = vmatpush.msra.mxu1 %v568_v44  ;;  %v323_v56 = vld [vmem:[%s1689_s13 + $0xf8] sm:$0xff] }
  0x56   : > { %964 = vperm.xlu1 %1569, %v887_v19   ;;  %1523 = vmatpush.msrb.mxu3 %v568_v44  ;;  %v1144_v19 = vsel %vm1112_vm11, 1, %v1615_v7  ;;  %vm1125_vm11 = vcmp.eq.s32.totalorder %v1959_v33, 1 }
  0x57   : > { %1522 = vmatpush.msra.mxu2 %v568_v44  ;;  %v1157_v35 = vsel %vm1125_vm11, 1, %v1615_v7 }
  0x5a   : > { %1467 = vmatmul.msk.f32.gmra.mxu0 %vm325_vm0, %v300_v47  ;;  %1485 = vmatmul.msk.f32.gmra.mxu3 %vm325_vm0, %v318_v48  ;;  %v567_v47 = vld [vmem:[%s2503_s3] sm:$0xff] }
  0x5b   : > { %v1929_v48 = vld [vmem:[%s1684_s10 + $0xa0] sm:$0xff]  ;;  %600 = vmatpush.msra.mxu1 %v567_v47  ;;  %1525 = vmatpush.msrb.mxu3 %v567_v47 }
  0x5c   : > { %vm853_vm13 = vcmp.eq.s32.totalorder %v1929_v48, 0  ;;  %1524 = vmatpush.msra.mxu2 %v567_v47  ;;  %v1156_v47 = vsel %vm1124_vm7, 1, %v1615_v7 }
  0x5d   : > { %970 = vperm.xlu0 %1568, %v889_v4   ;;  %v885_v54 = vsel %vm853_vm13, 1, %v1615_v7  ;;  %v891_v4 = vsel %vm859_vm5, 1, %v1615_v7  ;;  %vm1102_vm13 = vcmp.eq.s32.totalorder %v1739_v21, 1  ;;  %vm1119_vm5 = vcmp.eq.s32.totalorder %v1929_v48, 1 }
  0x5e   : > { %973 = vperm.xlu1 %1569, %v890_v38   ;;  %958 = vperm.xlu2 %1570, %v885_v54   ;;  %v1134_v42 = vsel %vm1102_vm13, 1, %v1615_v7  ;;  %v1151_v22 = vsel %vm1119_vm5, 1, %v1615_v7 }
  0x62   : > { %1468 = vmatmul.msk.f32.gmra.mxu0 %vm325_vm0, %v301_v58  ;;  %1486 = vmatmul.msk.f32.gmra.mxu3 %vm325_vm0, %v319_v59  ;;  %v1948_v58 = vld [vmem:[%s1684_s10 + $0xf8] sm:$0xff]  ;;  %v1135_v59 = vsel %vm1103_vm15, 1, %v1615_v7  ;;  %vm1105_vm15 = vcmp.eq.s32.totalorder %v1728_v16, 1 }
  0x63   : > { %vm864_vm2 = vcmp.eq.s32.totalorder %v1948_v58, 0  ;;  %v1137_v51 = vsel %vm1105_vm15, 1, %v1615_v7  ;;  %vm1130_vm13 = vcmp.eq.s32.totalorder %v1948_v58, 1  ;;  %vm1123_vm15 = vcmp.eq.s32.totalorder %v1847_v0, 1 }
  0x64   : > { %v896_v61 = vsel %vm864_vm2, 1, %v1615_v7  ;;  %vm1116_vm2 = vcmp.eq.s32.totalorder %v1901_v31, 1 }
  0x65   : > { %979 = vperm.xlu0 %1568, %v892_v23   ;;  %v1148_v16 = vsel %vm1116_vm2, 1, %v1615_v7  ;;  %vm1129_vm2 = vcmp.eq.s32.totalorder %v1909_v36, 1 }
  0x66   : > { %982 = vperm.xlu1 %1569, %v893_v55   ;;  %967 = vperm.xlu2 %1570, %v888_v60  }
  0x6a   : > { %1469 = vmatmul.msk.f32.gmra.mxu0 %vm325_vm0, %v302_v8  ;;  %1487 = vmatmul.msk.f32.gmra.mxu3 %vm325_vm0, %v320_v9  ;;  %v1970_v8 = vld [vmem:[%s1684_s10 + $0xe8] sm:$0xff] }
  0x6b   : > { %vm862_vm8 = vcmp.eq.s32.totalorder %v1970_v8, 0  ;;  %vm1128_vm14 = vcmp.eq.s32.totalorder %v1970_v8, 1  ;;  %v1155_v8 = vsel %vm1123_vm15, 1, %v1615_v7 }
  0x6c   : > { %v894_v9 = vsel %vm862_vm8, 1, %v1615_v7  ;;  %vm1122_vm8 = vcmp.eq.s32.totalorder %v1945_v57, 1  ;;  %v1162_v57 = vsel %vm1130_vm13, 1, %v1615_v7  ;;  %v1160_v43 = vsel %vm1128_vm14, 1, %v1615_v7 }
  0x6d   : > { %988 = vperm.xlu0 %1568, %v895_v40   ;;  %v1154_v28 = vsel %vm1122_vm8, 1, %v1615_v7 }
  0x6e   : > { %991 = vperm.xlu1 %1569, %v896_v61   ;;  %976 = vperm.xlu2 %1570, %v891_v4  }
  0x72   : > { %1470 = vmatmul.msk.f32.gmra.mxu0 %vm325_vm0, %v303_v25  ;;  %1488 = vmatmul.msk.f32.gmra.mxu3 %vm325_vm0, %v321_v26 }
  0x75   : > { %1167 = vperm.xlu0 %1568, %v1132_v53  }
  0x76   : > { %1170 = vperm.xlu1 %1569, %v1133_v2   ;;  %985 = vperm.xlu2 %1570, %v894_v9  }
  0x7a   : > { %1471 = vmatmul.msk.f32.gmra.mxu0 %vm325_vm0, %v304_v45  ;;  %1489 = vmatmul.msk.f32.gmra.mxu3 %vm325_vm0, %v322_v46 }
  0x7d   : > { %1176 = vperm.xlu0 %1568, %v1135_v59   ;;  %v2016_v31 = vpop.permute.xlu2 %910 }
  0x7e   : > { %1179 = vperm.xlu1 %1569, %v1136_v15   ;;  %1164 = vperm.xlu2 %1570, %v1131_v41   ;;  %vm997_vm9 = vcmp.eq.s32.totalorder %v2016_v31, 1 }
  0x82   : > { %1472 = vmatmul.msk.f32.gmra.mxu0 %vm325_vm0, %v305_v11  ;;  %1490 = vmatmul.msk.f32.gmra.mxu3 %vm325_vm0, %v323_v56  ;;  %v1159_v56 = vsel %vm1127_vm10, 1, %v1615_v7 }
  0x85   : > { %1185 = vperm.xlu0 %1568, %v1138_v3   ;;  %v2028_v48 = vpop.permute.xlu2 %913 }
  0x86   : > { %1188 = vperm.xlu1 %1569, %v1139_v34   ;;  %1173 = vperm.xlu2 %1570, %v1134_v42   ;;  %v1161_v42 = vsel %vm1129_vm2, 1, %v1615_v7  ;;  %vm998_vm11 = vcmp.eq.s32.totalorder %v2028_v48, 1 }
  0x8a   : > { %1473 = vmatmul.msk.f32.gmra.mxu0 %vm325_vm0, %v306_v1 }
  0x8d   : > { %1194 = vperm.xlu0 %1568, %v1141_v27   ;;  %v2046_v2 = vpop.permute.xlu2 %922 }
  0x8e   : > { %1197 = vperm.xlu1 %1569, %v1142_v6   ;;  %1182 = vperm.xlu2 %1570, %v1137_v51   ;;  %vm1001_vm14 = vcmp.eq.s32.totalorder %v2046_v2, 1 }
  0x8f   : > { %v2014_v44 = vpop.permute.xlu0 %898 }
  0x90   : > { %vm993_vm3 = vcmp.eq.s32.totalorder %v2014_v44, 1 }
  0x92   : > { %1474 = vmatmul.msk.f32.gmra.mxu0 %vm325_vm0, %v307_v5 }
  0x95   : > { %1203 = vperm.xlu0 %1568, %v1144_v19   ;;  %v2058_v27 = vpop.permute.xlu2 %931  ;;  %v1158_v19 = vsel %vm1126_vm1, 1, %v1615_v7 }
  0x96   : > { %1191 = vperm.xlu2 %1570, %v1140_v63   ;;  %vm1004_vm1 = vcmp.eq.s32.totalorder %v2058_v27, 1 }
  0x97   : > { %v439_v10 = vpop.f32.mrf.mxu0  ;;  %v2026_v55 = vpop.permute.xlu0 %901 }
  0x98   : > { %v535_v18 = vmax.f32 %v439_v10, 0.0  ;;  %vm994_vm5 = vcmp.eq.s32.totalorder %v2026_v55, 1 }
  0x9a   : > { %1475 = vmatmul.msk.f32.gmra.mxu0 %vm325_vm0, %v308_v12  ;;  %601 = vmatmul.f32.vlgmr.msra.gmra.mxu1 %v535_v18 }
  0x9d   : > { %v1986_v20 = vpop.f32.mrf.mxu3  ;;  %1212 = vperm.xlu0 %1568, %v1147_v50   ;;  %v2066_v41 = vpop.permute.xlu2 %940 }
  0x9e   : > { %1200 = vperm.xlu2 %1570, %v1143_v14  }
  0x9f   : > { %v442_v23 = vpop.f32.mrf.mxu0  ;;  %v2038_v1 = vpop.permute.xlu0 %916 }
  0xa0   : > { %v536_v25 = vmax.f32 %v442_v23, 0.0  ;;  %vm999_vm12 = vcmp.eq.s32.totalorder %v2038_v1, 1 }
  0xa2   : > { %1476 = vmatmul.msk.f32.gmra.mxu0 %vm325_vm0, %v309_v24  ;;  %604 = vmatmul.f32.gmra.mxu1 %v536_v25  ;;  %vm1113_vm0 = vcmp.eq.s32.totalorder %v1870_v13, 1  ;;  %v1153_v13 = vsel %vm1121_vm4, 1, %v1615_v7 }
  0xa3   : > { %v1145_v21 = vsel %vm1113_vm0, 1, %v1615_v7  ;;  %vm1120_vm0 = vcmp.eq.s32.totalorder %v1816_v52, 1 }
  0xa4   : > { %1206 = vperm.xlu1 %1569, %v1145_v21   ;;  %v1152_v58 = vsel %vm1120_vm0, 1, %v1615_v7  ;;  %v2086_v7 = vpop.permute.xlu1 %904 }
  0xa5   : > { %v1996_v26 = vpop.f32.mrf.mxu3  ;;  %1221 = vperm.xlu0 %1568, %v1150_v62   ;;  %vm995_vm7 = vcmp.eq.s32.totalorder %v2086_v7, 1 }
  0xa6   : > { %1209 = vperm.xlu2 %1570, %v1146_v32  }
  0xa7   : > { %v445_v29 = vpop.f32.mrf.mxu0  ;;  %v2054_v33 = vpop.permute.xlu0 %925 }
  0xa8   : > { %v537_v30 = vmax.f32 %v445_v29, 0.0  ;;  %v2074_v6 = vpop.permute.xlu2 %949  ;;  %vm1002_vm0 = vcmp.eq.s32.totalorder %v2054_v33, 1 }
  0xaa   : > { %607 = vmatmul.f32.gmra.mxu1 %v537_v30 }
  0xac   : > { %1215 = vperm.xlu1 %1569, %v1148_v16  }
  0xad   : > { %v2004_v37 = vpop.f32.mrf.mxu3  ;;  %1230 = vperm.xlu0 %1568, %v1153_v13  }
  0xae   : > { %1218 = vperm.xlu2 %1570, %v1149_v49  }
  0xaf   : > { %v448_v38 = vpop.f32.mrf.mxu0  ;;  %v2064_v12 = vpop.permute.xlu0 %934 }
  0xb0   : > { %v538_v39 = vmax.f32 %v448_v38, 0.0  ;;  %vm1005_vm2 = vcmp.eq.s32.totalorder %v2064_v12, 1 }
  0xb2   : > { %610 = vmatmul.f32.gmra.mxu1 %v538_v39 }
  0xb4   : > { %1224 = vperm.xlu1 %1569, %v1151_v22  }
  0xb5   : > { %v2012_v40 = vpop.f32.mrf.mxu3  ;;  %1239 = vperm.xlu0 %1568, %v1156_v47  }
  0xb6   : > { %1227 = vperm.xlu2 %1570, %v1152_v58  }
  0xb7   : > { %v451_v45 = vpop.f32.mrf.mxu0  ;;  %v2072_v24 = vpop.permute.xlu0 %943 }
  0xb8   : > { %v539_v46 = vmax.f32 %v451_v45, 0.0  ;;  %v2082_v21 = vpop.permute.xlu2 %958 }
  0xba   : > { %613 = vmatmul.f32.gmra.mxu1 %v539_v46 }
  0xbc   : > { %1233 = vperm.xlu1 %1569, %v1154_v28  }
  0xbd   : > { %v2024_v53 = vpop.f32.mrf.mxu3  ;;  %1248 = vperm.xlu0 %1568, %v1159_v56  }
  0xbe   : > { %1236 = vperm.xlu2 %1570, %v1155_v8  }
  0xbf   : > { %v454_v54 = vpop.f32.mrf.mxu0  ;;  %v2080_v30 = vpop.permute.xlu0 %952 }
  0xc0   : > { %v540_v11 = vmax.f32 %v454_v54, 0.0  ;;  %v2088_v13 = vpop.permute.xlu2 %967 }
  0xc2   : > { %616 = vmatmul.f32.gmra.mxu1 %v540_v11  ;;  %v2092_v11 = vpop.permute.xlu1 %907 }
  0xc3   : > { %vm996_vm8 = vcmp.eq.s32.totalorder %v2092_v11, 1 }
  0xc4   : > { %1242 = vperm.xlu1 %1569, %v1157_v35  }
  0xc5   : > { %v2036_v59 = vpop.f32.mrf.mxu3  ;;  %1257 = vperm.xlu0 %1568, %v1162_v57   ;;  %v2105_v57 = vld [vmem:[%s2504_s4] ss:$0 sm:$0xff] }
  0xc6   : > { %1245 = vperm.xlu2 %1570, %v1158_v19  }
  0xc7   : > { %v457_v60 = vpop.f32.mrf.mxu0  ;;  %v2084_v16 = vpop.permute.xlu0 %961 }
  0xc8   : > { %v541_v61 = vmax.f32 %v457_v60, 0.0  ;;  %v2094_v28 = vpop.permute.xlu2 %976 }
  0xca   : > { %619 = vmatmul.f32.gmra.mxu1 %v541_v61  ;;  %v2098_v35 = vpop.permute.xlu1 %919 }
  0xcb   : > { %vm1000_vm13 = vcmp.eq.s32.totalorder %v2098_v35, 1 }
  0xcc   : > { %1251 = vperm.xlu1 %1569, %v1160_v43  }
  0xcd   : > { %v2048_v3 = vpop.f32.mrf.mxu3 }
  0xce   : > { %1254 = vperm.xlu2 %1570, %v1161_v42  }
  0xcf   : > { %v460_v4 = vpop.f32.mrf.mxu0  ;;  %v2090_v14 = vpop.permute.xlu0 %970 }
  0xd0   : > { %v542_v5 = vmax.f32 %v460_v4, 0.0  ;;  %v2100_v49 = vpop.permute.xlu2 %985 }
  0xd2   : > { %622 = vmatmul.f32.gmra.mxu1 %v542_v5 }
  0xd5   : > { %v2056_v15 = vpop.f32.mrf.mxu3 }
  0xd7   : > { %v463_v9 = vpop.f32.mrf.mxu0  ;;  %v2096_v60 = vpop.permute.xlu0 %979 }
  0xd8   : > { %v543_v10 = vmax.f32 %v463_v9, 0.0  ;;  %v2111_v9 = vld [vmem:[%s2504_s4 + $0x1] ss:$0 sm:$0xff]  ;;  %v1165_v19 = vpop.permute.xlu2 %1164 }
  0xd9   : > { %vm1259_vm4 = vcmp.eq.s32.totalorder %v1165_v19, 1 }
  0xda   : > { %625 = vmatmul.f32.gmra.mxu1 %v543_v10 }
  0xdd   : > { %v2062_v52 = vpop.f32.mrf.mxu3 }
  0xdf   : > { %v466_v18 = vpop.f32.mrf.mxu0  ;;  %v2113_v10 = vpop.permute.xlu0 %988 }
  0xe0   : > { %v544_v34 = vmax.f32 %v466_v18, 0.0  ;;  %v2118_v18 = vld [vmem:[%s2504_s4 + $0x2] ss:$0 sm:$0xff] }
  0xe2   : > { %628 = vmatmul.f32.gmra.mxu1 %v544_v34  ;;  %v2120_v34 = vpop.permute.xlu1 %928 }
  0xe3   : > { %vm1003_vm15 = vcmp.eq.s32.totalorder %v2120_v34, 1 }
  0xe5   : > { %v2070_v23 = vpop.f32.mrf.mxu3 }
  0xe6   : > { %v562_v33 = vmax.f32 %v2070_v23, 0.0 }
  0xe7   : > { %v469_v0 = vpop.f32.mrf.mxu0 }
  0xe8   : > { %v545_v25 = vmax.f32 %v469_v0, 0.0 }
  0xea   : > { %631 = vmatmul.f32.gmra.mxu1 %v545_v25  ;;  %v2132_v44 = vpop.permute.xlu1 %937 }
  0xed   : > { %v2078_v50 = vpop.f32.mrf.mxu3 }
  0xef   : > { %v472_v17 = vpop.f32.mrf.mxu0 }
  0xf0   : > { %v546_v29 = vmax.f32 %v472_v17, 0.0 }
  0xf2   : > { %634 = vmatmul.f32.gmra.mxu1 %v546_v29 }
  0xf5   : > { %v526_v51 = vpop.f32.mrf.mxu3 }
  0xf6   : > { %v564_v62 = vmax.f32 %v526_v51, 0.0 }
  0xf7   : > { %v475_v38 = vpop.f32.mrf.mxu0 }
  0xf8   : > { %v547_v39 = vmax.f32 %v475_v38, 0.0  ;;  %688 = vmatmul.f32.vlgmr.msrb.gmra.mxu3 %v564_v62 }
  0xfa   : > { %637 = vmatmul.f32.gmra.mxu1 %v547_v39 }
  0xfd   : > { %v529_v36 = vpop.f32.mrf.mxu3 }
  0xfe   : > { %v565_v63 = vmax.f32 %v529_v36, 0.0  ;;  %v1168_v36 = vpop.permute.xlu0 %1167 }
  0xff   : > { %v478_v45 = vpop.f32.mrf.mxu0  ;;  %vm1260_vm6 = vcmp.eq.s32.totalorder %v1168_v36, 1 }
 0x100   : > { %v548_v46 = vmax.f32 %v478_v45, 0.0  ;;  %691 = vmatmul.f32.gmra.mxu3 %v565_v63 }
 0x102   : > { %640 = vmatmul.f32.gmra.mxu1 %v548_v46 }
 0x105   : > { %v532_v22 = vpop.f32.mrf.mxu3 }
 0x106   : > { %v566_v47 = vmax.f32 %v532_v22, 0.0  ;;  %v553_v22 = vmax.f32 %v1986_v20, 0.0 }
 0x107   : > { %v481_v54 = vpop.f32.mrf.mxu0 }
 0x108   : > { %v549_v32 = vmax.f32 %v481_v54, 0.0  ;;  %694 = vmatmul.f32.gmra.mxu3 %v566_v47 }
 0x10a   : > { %643 = vmatmul.f32.vlgmr.msra.gmra.mxu2 %v549_v32 }
 0x10f   : > { %v484_v56 = vpop.f32.mrf.mxu0 }
 0x110   : > { %v550_v61 = vmax.f32 %v484_v56, 0.0 }
 0x112   : > { %646 = vmatmul.f32.gmra.mxu2 %v550_v61 }
 0x117   : > { %v487_v4 = vpop.f32.mrf.mxu0  ;;  %v602_v5 = vpop.f32.mrf.mxu1 }
 0x118   : > { %v551_v43 = vmax.f32 %v487_v4, 0.0  ;;  %v603_v58 = vadd.f32 %v2105_v57, %v602_v5  ;;  %v554_v5 = vmax.f32 %v1996_v26, 0.0 }
 0x11a   : > { %v698_v8 = vmax.f32 %v603_v58, 0.0  ;;  %649 = vmatmul.f32.gmra.mxu2 %v551_v43  ;;  %v2147_v43 = vpop.permute.xlu1 %946 }
 0x11c   : > { %v732_v0 = vmul.f32 %v2111_v9, %v698_v8 }
 0x11e   : > { %v766_v25 = vadd.f32 %v2118_v18, %v732_v0 }
 0x11f   : > { %v490_v42 = vpop.f32.mrf.mxu0  ;;  %v605_v17 = vpop.f32.mrf.mxu1 }
 0x120   : > { %v2125_v29 = vsel %vm993_vm3, %v766_v25, -inf  ;;  %v2127_v51 = vsel %vm1259_vm4, %v766_v25, -inf  ;;  %v552_v62 = vmax.f32 %v490_v42, 0.0  ;;  %v606_v38 = vadd.f32 %v2105_v57, %v605_v17 }
 0x121   : > { %v555_v25 = vmax.f32 %v2004_v37, 0.0  ;;  %v556_v37 = vmax.f32 %v2012_v40, 0.0  ;;  %vm1006_vm3 = vcmp.eq.s32.totalorder %v2132_v44, 1 }
 0x122   : > { %v699_v39 = vmax.f32 %v606_v38, 0.0  ;;  %652 = vmatmul.f32.gmra.mxu2 %v552_v62  ;;  %v2163_v17 = vpop.permute.xlu1 %955  ;;  %v1177_v38 = vpop.permute.xlu0 %1176 }
 0x123   : > { %vm1263_vm10 = vcmp.eq.s32.totalorder %v1177_v38, 1 }
 0x124   : > { %v733_v63 = vmul.f32 %v2111_v9, %v699_v39 }
 0x126   : > { %v767_v45 = vadd.f32 %v2118_v18, %v733_v63 }
 0x127   : > { %v608_v46 = vpop.f32.mrf.mxu1 }
 0x128   : > { %v2136_v47 = vsel %vm994_vm5, %v767_v45, -inf  ;;  %v2138_v54 = vsel %vm1260_vm6, %v767_v45, -inf  ;;  %v609_v32 = vadd.f32 %v2105_v57, %v608_v46 }
 0x12a   : > { %v700_v56 = vmax.f32 %v609_v32, 0.0  ;;  %655 = vmatmul.f32.gmra.mxu2 %v553_v22 }
 0x12c   : > { %v734_v61 = vmul.f32 %v2111_v9, %v700_v56 }
 0x12e   : > { %v2144_v55 = vadd.f32 %v2118_v18, %v734_v61  ;;  %v2175_v61 = vpop.permute.xlu1 %964 }
 0x12f   : > { %v611_v4 = vpop.f32.mrf.mxu1 }
 0x130   : > { %v2150_v20 = vsel %vm995_vm7, %v2144_v55, -inf  ;;  %v612_v58 = vadd.f32 %v2105_v57, %v611_v4  ;;  %vm1007_vm7 = vcmp.eq.s32.totalorder %v2066_v41, 1 }
 0x132   : > { %v701_v8 = vmax.f32 %v612_v58, 0.0  ;;  %658 = vmatmul.f32.gmra.mxu2 %v554_v5  ;;  %v557_v5 = vmax.f32 %v2024_v53, 0.0  ;;  %v558_v53 = vmax.f32 %v2036_v59, 0.0 }
 0x134   : > { %v735_v19 = vmul.f32 %v2111_v9, %v701_v8 }
 0x136   : > { %v2156_v7 = vadd.f32 %v2118_v18, %v735_v19 }
 0x137   : > { %v614_v0 = vpop.f32.mrf.mxu1 }
 0x138   : > { %v2160_v26 = vsel %vm996_vm8, %v2156_v7, -inf  ;;  %v615_v42 = vadd.f32 %v2105_v57, %v614_v0 }
 0x13a   : > { %v702_v62 = vmax.f32 %v615_v42, 0.0  ;;  %661 = vmatmul.f32.gmra.mxu2 %v555_v25  ;;  %v2188_v25 = vpop.permute.xlu1 %973 }
 0x13c   : > { %v736_v39 = vmul.f32 %v2111_v9, %v702_v62 }
 0x13e   : > { %v770_v11 = vadd.f32 %v2118_v18, %v736_v39 }
 0x13f   : > { %v617_v36 = vpop.f32.mrf.mxu1 }
 0x140   : > { %v1029_v63 = vsel %vm997_vm9, %v770_v11, -inf  ;;  %v2169_v45 = vsel %vm1263_vm10, %v770_v11, -inf  ;;  %v618_v46 = vadd.f32 %v2105_v57, %v617_v36 }
 0x141   : > { %v1057_v22 = vmax.f32 %v2125_v29, %v1029_v63  ;;  %v1323_v32 = vmax.f32 %v2127_v51, %v2169_v45 }
 0x142   : > { %v703_v56 = vmax.f32 %v618_v46, 0.0  ;;  %664 = vmatmul.f32.gmra.mxu2 %v556_v37  ;;  %v559_v37 = vmax.f32 %v2048_v3, 0.0  ;;  %v2203_v63 = vpop.permute.xlu1 %982  ;;  %v560_v3 = vmax.f32 %v2056_v15, 0.0  ;;  %v561_v15 = vmax.f32 %v2062_v52, 0.0 }
 0x144   : > { %v737_v31 = vmul.f32 %v2111_v9, %v703_v56 }
 0x146   : > { %v2180_v40 = vadd.f32 %v2118_v18, %v737_v31 }
 0x147   : > { %v620_v4 = vpop.f32.mrf.mxu1 }
 0x148   : > { %v1030_v58 = vsel %vm998_vm11, %v2180_v40, -inf  ;;  %v621_v29 = vadd.f32 %v2105_v57, %v620_v4 }
 0x149   : > { %v1058_v8 = vmax.f32 %v2136_v47, %v1030_v58 }
 0x14a   : > { %v704_v19 = vmax.f32 %v621_v29, 0.0  ;;  %667 = vmatmul.f32.gmra.mxu2 %v557_v5 }
 0x14c   : > { %v738_v0 = vmul.f32 %v2111_v9, %v704_v19  ;;  %v2218_v19 = vpop.permute.xlu1 %991 }
 0x14e   : > { %v2191_v48 = vadd.f32 %v2118_v18, %v738_v0 }
 0x14f   : > { %v623_v42 = vpop.f32.mrf.mxu1 }
 0x150   : > { %v1031_v62 = vsel %vm999_vm12, %v2191_v48, -inf  ;;  %v624_v38 = vadd.f32 %v2105_v57, %v623_v42  ;;  %vm1008_vm12 = vcmp.eq.s32.totalorder %v2072_v24, 1 }
 0x151   : > { %v1059_v47 = vmax.f32 %v2150_v20, %v1031_v62 }
 0x152   : > { %v705_v39 = vmax.f32 %v624_v38, 0.0  ;;  %670 = vmatmul.f32.gmra.mxu2 %v558_v53 }
 0x154   : > { %v739_v11 = vmul.f32 %v2111_v9, %v705_v39  ;;  %v1171_v39 = vpop.permute.xlu1 %1170 }
 0x155   : > { %vm1261_vm5 = vcmp.eq.s32.totalorder %v1171_v39, 1 }
 0x156   : > { %v2200_v1 = vadd.f32 %v2118_v18, %v739_v11  ;;  %v1293_v44 = vsel %vm1261_vm5, %v2144_v55, -inf  ;;  %vm1010_vm5 = vcmp.eq.s32.totalorder %v2074_v6, 1 }
 0x157   : > { %v626_v36 = vpop.f32.mrf.mxu1 }
 0x158   : > { %v1032_v59 = vsel %vm1000_vm13, %v2200_v1, -inf  ;;  %v627_v46 = vadd.f32 %v2105_v57, %v626_v36 }
 0x159   : > { %v1060_v20 = vmax.f32 %v2160_v26, %v1032_v59 }
 0x15a   : > { %v706_v56 = vmax.f32 %v627_v46, 0.0  ;;  %673 = vmatmul.f32.gmra.mxu2 %v559_v37 }
 0x15c   : > { %v740_v31 = vmul.f32 %v2111_v9, %v706_v56 }
 0x15e   : > { %v2211_v35 = vadd.f32 %v2118_v18, %v740_v31 }
 0x15f   : > { %v629_v4 = vpop.f32.mrf.mxu1 }
 0x160   : > { %v1033_v5 = vsel %vm1001_vm14, %v2211_v35, -inf  ;;  %v630_v58 = vadd.f32 %v2105_v57, %v629_v4  ;;  %v2238_v4 = vpop.permute.xlu1 %1179 }
 0x161   : > { %v2216_v29 = vmax.f32 %v1057_v22, %v1033_v5  ;;  %v563_v5 = vmax.f32 %v2078_v50, 0.0 }
 0x162   : > { %v707_v26 = vmax.f32 %v630_v58, 0.0  ;;  %676 = vmatmul.f32.gmra.mxu2 %v560_v3 }
 0x164   : > { %v741_v0 = vmul.f32 %v2111_v9, %v707_v26 }
 0x166   : > { %v2222_v2 = vadd.f32 %v2118_v18, %v741_v0 }
 0x167   : > { %v632_v42 = vpop.f32.mrf.mxu1 }
 0x168   : > { %v1034_v53 = vsel %vm1002_vm0, %v2222_v2, -inf  ;;  %v633_v62 = vadd.f32 %v2105_v57, %v632_v42  ;;  %v1189_v27 = vpop.permute.xlu1 %1188 }
 0x169   : > { %v2228_v22 = vmax.f32 %v1058_v8, %v1034_v53  ;;  %v1174_v8 = vpop.permute.xlu2 %1173  ;;  %vm1267_vm13 = vcmp.eq.s32.totalorder %v1189_v27, 1 }
 0x16a   : > { %v708_v38 = vmax.f32 %v633_v62, 0.0  ;;  %679 = vmatmul.f32.gmra.mxu2 %v561_v15  ;;  %vm1262_vm10 = vcmp.eq.s32.totalorder %v1174_v8, 1 }
 0x16c   : > { %v742_v11 = vmul.f32 %v2111_v9, %v708_v38 }
 0x16e   : > { %v776_v36 = vadd.f32 %v2118_v18, %v742_v11 }
 0x16f   : > { %v635_v37 = vpop.f32.mrf.mxu1 }
 0x170   : > { %v1035_v59 = vsel %vm1003_vm15, %v776_v36, -inf  ;;  %v636_v52 = vadd.f32 %v2105_v57, %v635_v37  ;;  %v1186_v37 = vpop.permute.xlu0 %1185  ;;  %vm1264_vm15 = vcmp.eq.s32.totalorder %v2238_v4, 1 }
 0x171   : > { %v2235_v46 = vmax.f32 %v1059_v47, %v1035_v59  ;;  %v1183_v42 = vpop.permute.xlu2 %1182  ;;  %vm1266_vm8 = vcmp.eq.s32.totalorder %v1186_v37, 1 }
 0x172   : > { %v709_v56 = vmax.f32 %v636_v52, 0.0  ;;  %682 = vmatmul.f32.gmra.mxu2 %v562_v33  ;;  %vm1265_vm4 = vcmp.eq.s32.totalorder %v1183_v42, 1  ;;  %v1298_v41 = vsel %vm1266_vm8, %v2200_v1, -inf }
 0x174   : > { %v743_v31 = vmul.f32 %v2111_v9, %v709_v56  ;;  %v1198_v56 = vpop.permute.xlu1 %1197 }
 0x175   : > { %vm1270_vm11 = vcmp.eq.s32.totalorder %v1198_v56, 1 }
 0x176   : > { %v777_v3 = vadd.f32 %v2118_v18, %v743_v31 }
 0x177   : > { %v638_v34 = vpop.f32.mrf.mxu1 }
 0x178   : > { %v1036_v23 = vsel %vm1004_vm1, %v777_v3, -inf  ;;  %v639_v58 = vadd.f32 %v2105_v57, %v638_v34  ;;  %vm1009_vm1 = vcmp.eq.s32.totalorder %v2147_v43, 1 }
 0x179   : > { %v2244_v26 = vmax.f32 %v1060_v20, %v1036_v23  ;;  %v2262_v12 = vpop.permute.xlu2 %1191  ;;  %v1297_v23 = vsel %vm1265_vm4, %v2191_v48, -inf }
 0x17a   : > { %v710_v47 = vmax.f32 %v639_v58, 0.0  ;;  %685 = vmatmul.f32.gmra.mxu2 %v563_v5  ;;  %v1195_v5 = vpop.permute.xlu0 %1194 }
 0x17b   : > { %vm1269_vm6 = vcmp.eq.s32.totalorder %v1195_v5, 1 }
 0x17c   : > { %v744_v0 = vmul.f32 %v2111_v9, %v710_v47 }
 0x17e   : > { %v2248_v15 = vadd.f32 %v2118_v18, %v744_v0  ;;  %v1301_v0 = vsel %vm1269_vm6, %v776_v36, -inf }
 0x17f   : > { %v641_v53 = vpop.f32.mrf.mxu1 }
 0x180   : > { %v2252_v62 = vsel %vm1005_vm2, %v2248_v15, -inf  ;;  %v642_v50 = vadd.f32 %v2105_v57, %v641_v53  ;;  %vm1268_vm2 = vcmp.eq.s32.totalorder %v2262_v12, 1 }
 0x181   : > { %v1065_v20 = vmax.f32 %v2216_v29, %v2252_v62  ;;  %v1201_v47 = vpop.permute.xlu2 %1200  ;;  %v1300_v43 = vsel %vm1268_vm2, %v2222_v2, -inf  ;;  %vm1019_vm2 = vcmp.eq.s32.totalorder %v2094_v28, 1 }
 0x182   : > { %v711_v38 = vmax.f32 %v642_v50, 0.0  ;;  %v1325_v50 = vmax.f32 %v1293_v44, %v1297_v23  ;;  %v1204_v5 = vpop.permute.xlu0 %1203  ;;  %v1294_v23 = vsel %vm1262_vm10, %v2156_v7, -inf  ;;  %vm1271_vm0 = vcmp.eq.s32.totalorder %v1201_v47, 1 }
 0x183   : > { %v1303_v27 = vsel %vm1271_vm0, %v2248_v15, -inf  ;;  %v1296_v15 = vsel %vm1264_vm15, %v2180_v40, -inf  ;;  %vm1272_vm4 = vcmp.eq.s32.totalorder %v1204_v5, 1  ;;  %vm1017_vm0 = vcmp.eq.s32.totalorder %v2090_v14, 1 }
 0x184   : > { %v745_v11 = vmul.f32 %v2111_v9, %v711_v38  ;;  %v1207_v38 = vpop.permute.xlu1 %1206  ;;  %v2275_v39 = vmax.f32 %v1325_v50, %v1301_v0  ;;  %v1326_v0 = vmax.f32 %v1294_v23, %v1298_v41  ;;  %v1324_v12 = vmax.f32 %v2138_v54, %v1296_v15 }
 0x185   : > { %vm1273_vm9 = vcmp.eq.s32.totalorder %v1207_v38, 1  ;;  %vm1018_vm15 = vcmp.eq.s32.totalorder %v2188_v25, 1 }
 0x186   : > { %v2259_v33 = vadd.f32 %v2118_v18, %v745_v11 }
 0x188   : > { %v2265_v59 = vsel %vm1006_vm3, %v2259_v33, -inf }
 0x189   : > { %v1066_v52 = vmax.f32 %v2228_v22, %v2265_v59 }
 0x18d   : > { %v644_v31 = vpop.f32.mrf.mxu2 }
 0x18e   : > { %v645_v34 = vadd.f32 %v2105_v57, %v644_v31 }
 0x190   : > { %v712_v58 = vmax.f32 %v645_v34, 0.0 }
 0x192   : > { %v746_v53 = vmul.f32 %v2111_v9, %v712_v58  ;;  %v1302_v58 = vsel %vm1270_vm11, %v777_v3, -inf  ;;  %vm1013_vm11 = vcmp.eq.s32.totalorder %v2082_v21, 1 }
 0x193   : > { %v2291_v50 = vmax.f32 %v1326_v0, %v1302_v58  ;;  %v1328_v0 = vmax.f32 %v1324_v12, %v1300_v43 }
 0x194   : > { %v780_v11 = vadd.f32 %v2118_v18, %v746_v53  ;;  %v1210_v53 = vpop.permute.xlu2 %1209 }
 0x195   : > { %v647_v42 = vpop.f32.mrf.mxu2  ;;  %vm1274_vm14 = vcmp.eq.s32.totalorder %v1210_v53, 1  ;;  %v1216_v53 = vpop.permute.xlu1 %1215 }
 0x196   : > { %v2277_v48 = vsel %vm1007_vm7, %v780_v11, -inf  ;;  %v2279_v31 = vsel %vm1273_vm9, %v780_v11, -inf  ;;  %v648_v55 = vadd.f32 %v2105_v57, %v647_v42  ;;  %v1299_v42 = vsel %vm1267_vm13, %v2211_v35, -inf }
 0x197   : > { %v1067_v36 = vmax.f32 %v2235_v46, %v2277_v48  ;;  %v1333_v34 = vmax.f32 %v2275_v39, %v2279_v31  ;;  %v1327_v41 = vmax.f32 %v1323_v32, %v1299_v42  ;;  %vm1276_vm6 = vcmp.eq.s32.totalorder %v1216_v53, 1  ;;  %v689_v53 = vpop.f32.mrf.mxu3 }
 0x198   : > { %v713_v37 = vmax.f32 %v648_v55, 0.0  ;;  %vm1011_vm7 = vcmp.eq.s32.totalorder %v2080_v30, 1  ;;  %vm1012_vm9 = vcmp.eq.s32.totalorder %v2163_v17, 1  ;;  %vm1015_vm13 = vcmp.eq.s32.totalorder %v2175_v61, 1 }
 0x199   : > { %v1331_v35 = vmax.f32 %v1327_v41, %v1303_v27 }
 0x19a   : > { %v747_v44 = vmul.f32 %v2111_v9, %v713_v37  ;;  %v1213_v37 = vpop.permute.xlu0 %1212 }
 0x19b   : > { %vm1275_vm3 = vcmp.eq.s32.totalorder %v1213_v37, 1 }
 0x19c   : > { %v781_v8 = vadd.f32 %v2118_v18, %v747_v44  ;;  %v1304_v44 = vsel %vm1272_vm4, %v2259_v33, -inf }
 0x19d   : > { %v650_v38 = vpop.f32.mrf.mxu2  ;;  %v1332_v29 = vmax.f32 %v1328_v0, %v1304_v44 }
 0x19e   : > { %v2293_v1 = vsel %vm1008_vm12, %v781_v8, -inf  ;;  %v2295_v56 = vsel %vm1274_vm14, %v781_v8, -inf  ;;  %v651_v7 = vadd.f32 %v2105_v57, %v650_v38  ;;  %vm1014_vm12 = vcmp.eq.s32.totalorder %v2084_v16, 1 }
 0x19f   : > { %v1068_v3 = vmax.f32 %v2244_v26, %v2293_v1  ;;  %v1334_v11 = vmax.f32 %v2291_v50, %v2295_v56  ;;  %v1219_v1 = vpop.permute.xlu2 %1218  ;;  %vm1016_vm14 = vcmp.eq.s32.totalorder %v2088_v13, 1 }
 0x1a0   : > { %v714_v24 = vmax.f32 %v651_v7, 0.0  ;;  %vm1277_vm8 = vcmp.eq.s32.totalorder %v1219_v1, 1 }
 0x1a2   : > { %v748_v55 = vmul.f32 %v2111_v9, %v714_v24  ;;  %v1222_v30 = vpop.permute.xlu0 %1221 }
 0x1a3   : > { %vm1278_vm10 = vcmp.eq.s32.totalorder %v1222_v30, 1 }
 0x1a4   : > { %v782_v26 = vadd.f32 %v2118_v18, %v748_v55 }
 0x1a5   : > { %v653_v47 = vpop.f32.mrf.mxu2 }
 0x1a6   : > { %v1041_v23 = vsel %vm1009_vm1, %v782_v26, -inf  ;;  %v1307_v58 = vsel %vm1275_vm3, %v782_v26, -inf  ;;  %v654_v4 = vadd.f32 %v2105_v57, %v653_v47  ;;  %vm1022_vm1 = vcmp.eq.s32.totalorder %v2100_v49, 1 }
 0x1a7   : > { %v2317_v51 = vmax.f32 %v1065_v20, %v1041_v23  ;;  %v2319_v45 = vmax.f32 %v1331_v35, %v1307_v58  ;;  %vm1023_vm3 = vcmp.eq.s32.totalorder %v2113_v10, 1 }
 0x1a8   : > { %v715_v32 = vmax.f32 %v654_v4, 0.0 }
 0x1aa   : > { %v749_v40 = vmul.f32 %v2111_v9, %v715_v32 }
 0x1ac   : > { %v783_v8 = vadd.f32 %v2118_v18, %v749_v40 }
 0x1ad   : > { %v656_v62 = vpop.f32.mrf.mxu2 }
 0x1ae   : > { %v1042_v20 = vsel %vm1010_vm5, %v783_v8, -inf  ;;  %v1308_v50 = vsel %vm1276_vm6, %v783_v8, -inf  ;;  %v657_v2 = vadd.f32 %v2105_v57, %v656_v62  ;;  %v1231_v62 = vpop.permute.xlu0 %1230  ;;  %vm1020_vm5 = vcmp.eq.s32.totalorder %v2096_v60, 1 }
 0x1af   : > { %v2331_v54 = vmax.f32 %v1066_v52, %v1042_v20  ;;  %v2333_v33 = vmax.f32 %v1332_v29, %v1308_v50  ;;  %v2382_v20 = vpop.permute.xlu2 %1227  ;;  %vm1281_vm4 = vcmp.eq.s32.totalorder %v1231_v62, 1 }
 0x1b0   : > { %v716_v5 = vmax.f32 %v657_v2, 0.0 }
 0x1b2   : > { %v750_v38 = vmul.f32 %v2111_v9, %v716_v5 }
 0x1b4   : > { %v784_v6 = vadd.f32 %v2118_v18, %v750_v38  ;;  %v690_v38 = vadd.f32 %v2105_v57, %v689_v53 }
 0x1b5   : > { %v659_v56 = vpop.f32.mrf.mxu2 }
 0x1b6   : > { %v1043_v7 = vsel %vm1011_vm7, %v784_v6, -inf  ;;  %v1309_v42 = vsel %vm1277_vm8, %v784_v6, -inf  ;;  %v660_v24 = vadd.f32 %v2105_v57, %v659_v56  ;;  %v692_v6 = vpop.f32.mrf.mxu3  ;;  %vm1024_vm8 = vcmp.eq.s32.totalorder %v2218_v19, 1 }
 0x1b7   : > { %v2342_v22 = vmax.f32 %v1067_v36, %v1043_v7  ;;  %v2347_v59 = vmax.f32 %v1333_v34, %v1309_v42  ;;  %v2396_v7 = vpop.permute.xlu1 %1224  ;;  %v727_v42 = vmax.f32 %v690_v38, 0.0 }
 0x1b8   : > { %v717_v52 = vmax.f32 %v660_v24, 0.0 }
 0x1ba   : > { %v751_v27 = vmul.f32 %v2111_v9, %v717_v52  ;;  %v2404_v52 = vpop.permute.xlu2 %1236 }
 0x1bc   : > { %v785_v55 = vadd.f32 %v2118_v18, %v751_v27 }
 0x1bd   : > { %v662_v41 = vpop.f32.mrf.mxu2 }
 0x1be   : > { %v1044_v37 = vsel %vm1012_vm9, %v785_v55, -inf  ;;  %v1310_v26 = vsel %vm1278_vm10, %v785_v55, -inf  ;;  %v663_v46 = vadd.f32 %v2105_v57, %v662_v41  ;;  %v761_v41 = vmul.f32 %v2111_v9, %v727_v42 }
 0x1bf   : > { %v2353_v48 = vmax.f32 %v1068_v3, %v1044_v37  ;;  %v2355_v36 = vmax.f32 %v1334_v11, %v1310_v26  ;;  %v693_v37 = vadd.f32 %v2105_v57, %v692_v6  ;;  %vm1279_vm9 = vcmp.eq.s32.totalorder %v2396_v7, 1 }
 0x1c0   : > { %v718_v39 = vmax.f32 %v663_v46, 0.0  ;;  %v2414_v14 = vadd.f32 %v2118_v18, %v761_v41  ;;  %vm1280_vm10 = vcmp.eq.s32.totalorder %v2382_v20, 1 }
 0x1c2   : > { %v752_v31 = vmul.f32 %v2111_v9, %v718_v39  ;;  %v728_v39 = vmax.f32 %v693_v37, 0.0 }
 0x1c4   : > { %v2359_v34 = vadd.f32 %v2118_v18, %v752_v31  ;;  %v695_v31 = vpop.f32.mrf.mxu3  ;;  %v762_v25 = vmul.f32 %v2111_v9, %v728_v39 }
 0x1c5   : > { %v665_v35 = vpop.f32.mrf.mxu2 }
 0x1c6   : > { %v1045_v17 = vsel %vm1013_vm11, %v2359_v34, -inf  ;;  %v666_v47 = vadd.f32 %v2105_v57, %v665_v35  ;;  %v796_v49 = vadd.f32 %v2118_v18, %v762_v25 }
 0x1c7   : > { %v1073_v15 = vmax.f32 %v2317_v51, %v1045_v17 }
 0x1c8   : > { %v719_v23 = vmax.f32 %v666_v47, 0.0  ;;  %v1234_v47 = vpop.permute.xlu1 %1233 }
 0x1c9   : > { %vm1282_vm6 = vcmp.eq.s32.totalorder %v1234_v47, 1 }
 0x1ca   : > { %v753_v3 = vmul.f32 %v2111_v9, %v719_v23 }
 0x1cc   : > { %v2367_v11 = vadd.f32 %v2118_v18, %v753_v3  ;;  %v696_v3 = vadd.f32 %v2105_v57, %v695_v31 }
 0x1cd   : > { %v668_v58 = vpop.f32.mrf.mxu2 }
 0x1ce   : > { %v1046_v4 = vsel %vm1014_vm12, %v2367_v11, -inf  ;;  %v669_v21 = vadd.f32 %v2105_v57, %v668_v58  ;;  %vm1283_vm12 = vcmp.eq.s32.totalorder %v2404_v52, 1 }
 0x1cf   : > { %v1074_v43 = vmax.f32 %v2331_v54, %v1046_v4 }
 0x1d0   : > { %v720_v32 = vmax.f32 %v669_v21, 0.0  ;;  %v1246_v21 = vpop.permute.xlu2 %1245  ;;  %v1243_v38 = vpop.permute.xlu1 %1242 }
 0x1d1   : > { %vm1285_vm7 = vcmp.eq.s32.totalorder %v1243_v38, 1 }
 0x1d2   : > { %v754_v12 = vmul.f32 %v2111_v9, %v720_v32  ;;  %v2429_v32 = vsel %vm1022_vm1, %v2414_v14, -inf }
 0x1d4   : > { %v2375_v51 = vadd.f32 %v2118_v18, %v754_v12 }
 0x1d5   : > { %v671_v44 = vpop.f32.mrf.mxu2 }
 0x1d6   : > { %v1047_v40 = vsel %vm1015_vm13, %v2375_v51, -inf  ;;  %v672_v16 = vadd.f32 %v2105_v57, %v671_v44  ;;  %v1313_v6 = vsel %vm1281_vm4, %v2375_v51, -inf  ;;  %vm1286_vm13 = vcmp.eq.s32.totalorder %v1246_v21, 1 }
 0x1d7   : > { %v1075_v0 = vmax.f32 %v2342_v22, %v1047_v40  ;;  %v2402_v22 = vpop.permute.xlu0 %1239 }
 0x1d8   : > { %v721_v8 = vmax.f32 %v672_v16, 0.0  ;;  %v729_v16 = vmax.f32 %v696_v3, 0.0  ;;  %vm1284_vm11 = vcmp.eq.s32.totalorder %v2402_v22, 1  ;;  %v1252_v21 = vpop.permute.xlu1 %1251 }
 0x1da   : > { %v755_v29 = vmul.f32 %v2111_v9, %v721_v8 }
 0x1dc   : > { %v2385_v50 = vadd.f32 %v2118_v18, %v755_v29 }
 0x1dd   : > { %v674_v61 = vpop.f32.mrf.mxu2 }
 0x1de   : > { %v2389_v2 = vsel %vm1016_vm14, %v2385_v50, -inf  ;;  %v675_v54 = vadd.f32 %v2105_v57, %v674_v61  ;;  %v763_v61 = vmul.f32 %v2111_v9, %v729_v16  ;;  %v1314_v10 = vsel %vm1282_vm6, %v2385_v50, -inf }
 0x1df   : > { %v1076_v5 = vmax.f32 %v2353_v48, %v2389_v2  ;;  %v2426_v4 = vpop.permute.xlu0 %1248  ;;  %v1342_v50 = vmax.f32 %v2355_v36, %v1314_v10 }
 0x1e0   : > { %v722_v1 = vmax.f32 %v675_v54, 0.0  ;;  %v797_v51 = vadd.f32 %v2118_v18, %v763_v61  ;;  %vm1287_vm1 = vcmp.eq.s32.totalorder %v2426_v4, 1 }
 0x1e2   : > { %v756_v56 = vmul.f32 %v2111_v9, %v722_v1  ;;  %v1055_v1 = vsel %vm1023_vm3, %v796_v49, -inf  ;;  %v1056_v31 = vsel %vm1024_vm8, %v797_v51, -inf }
 0x1e4   : > { %v2399_v13 = vadd.f32 %v2118_v18, %v756_v56 }
 0x1e5   : > { %v677_v24 = vpop.f32.mrf.mxu2 }
 0x1e6   : > { %v1049_v27 = vsel %vm1017_vm0, %v2399_v13, -inf  ;;  %v678_v30 = vadd.f32 %v2105_v57, %v677_v24  ;;  %v1255_v24 = vpop.permute.xlu2 %1254  ;;  %v1315_v48 = vsel %vm1283_vm12, %v2399_v13, -inf }
 0x1e7   : > { %v2408_v55 = vmax.f32 %v1073_v15, %v1049_v27  ;;  %v1258_v42 = vpop.permute.xlu0 %1257  ;;  %vm1289_vm0 = vcmp.eq.s32.totalorder %v1255_v24, 1 }
 0x1e8   : > { %v723_v26 = vmax.f32 %v678_v30, 0.0  ;;  %vm1290_vm14 = vcmp.eq.s32.totalorder %v1258_v42, 1  ;;  %v1321_v39 = vsel %vm1289_vm0, %v796_v49, -inf }
 0x1e9   : > { %v1322_v36 = vsel %vm1290_vm14, %v797_v51, -inf }
 0x1ea   : > { %v757_v46 = vmul.f32 %v2111_v9, %v723_v26  ;;  %v1312_v26 = vsel %vm1280_vm10, %v2367_v11, -inf  ;;  %v1311_v11 = vsel %vm1279_vm9, %v2359_v34, -inf }
 0x1ec   : > { %v2417_v35 = vadd.f32 %v2118_v18, %v757_v46 }
 0x1ed   : > { %v680_v17 = vpop.f32.mrf.mxu2 }
 0x1ee   : > { %v1050_v15 = vsel %vm1018_vm15, %v2417_v35, -inf  ;;  %v681_v23 = vadd.f32 %v2105_v57, %v680_v17  ;;  %v1316_v60 = vsel %vm1284_vm11, %v2417_v35, -inf  ;;  %vm1021_vm15 = vcmp.eq.s32.totalorder %v2203_v63, 1 }
 0x1ef   : > { %v2424_v58 = vmax.f32 %v1074_v43, %v1050_v15 }
 0x1f0   : > { %v724_v12 = vmax.f32 %v681_v23, 0.0 }
 0x1f1   : > { %v1082_v44 = vmax.f32 %v2424_v58, %v2429_v32 }
 0x1f2   : > { %v758_v40 = vmul.f32 %v2111_v9, %v724_v12 }
 0x1f4   : > { %v792_v43 = vadd.f32 %v2118_v18, %v758_v40 }
 0x1f5   : > { %v683_v53 = vpop.f32.mrf.mxu2 }
 0x1f6   : > { %v1051_v8 = vsel %vm1019_vm2, %v792_v43, -inf  ;;  %v684_v29 = vadd.f32 %v2105_v57, %v683_v53  ;;  %v1317_v62 = vsel %vm1285_vm7, %v792_v43, -inf  ;;  %vm1288_vm2 = vcmp.eq.s32.totalorder %v1252_v21, 1 }
 0x1f7   : > { %v1079_v54 = vmax.f32 %v1075_v0, %v1051_v8  ;;  %v1341_v0 = vmax.f32 %v2347_v59, %v1313_v6  ;;  %v1320_v35 = vsel %vm1288_vm2, %v2414_v14, -inf  ;;  %v830_v8 = vlaneseq }
 0x1f8   : > { %v725_v56 = vmax.f32 %v684_v29, 0.0 }
 0x1f9   : > { %v1083_v28 = vmax.f32 %v1079_v54, %v1055_v1  ;;  %v1345_v41 = vmax.f32 %v1341_v0, %v1317_v62  ;;  %v832_v1 = vld [vmem:[%s1679_s7] sm:$0x3] }
 0x1fa   : > { %v759_v27 = vmul.f32 %v2111_v9, %v725_v56 }
 0x1fb   : > { %v1349_v23 = vmax.f32 %v1345_v41, %v1321_v39 }
 0x1fc   : > { %v793_v30 = vadd.f32 %v2118_v18, %v759_v27 }
 0x1fd   : > { %v686_v37 = vpop.f32.mrf.mxu2 }
 0x1fe   : > { %v1052_v20 = vsel %vm1020_vm5, %v793_v30, -inf  ;;  %v1318_v46 = vsel %vm1286_vm13, %v793_v30, -inf  ;;  %v687_v59 = vadd.f32 %v2105_v57, %v686_v37  ;;  %v1340_v57 = vmax.f32 %v2333_v33, %v1312_v26 }
 0x1ff   : > { %v1080_v17 = vmax.f32 %v1076_v5, %v1052_v20  ;;  %v1346_v47 = vmax.f32 %v1342_v50, %v1318_v46  ;;  %v1339_v5 = vmax.f32 %v2319_v45, %v1311_v11 }
 0x200   : > { %v726_v15 = vmax.f32 %v687_v59, 0.0  ;;  %v1344_v34 = vmax.f32 %v1340_v57, %v1316_v60 }
 0x201   : > { %v1084_v19 = vmax.f32 %v1080_v17, %v1056_v31  ;;  %v1350_v3 = vmax.f32 %v1346_v47, %v1322_v36  ;;  %v1343_v33 = vmax.f32 %v1339_v5, %v1315_v48 }
 0x202   : > { %v760_v2 = vmul.f32 %v2111_v9, %v726_v15  ;;  %v1348_v13 = vmax.f32 %v1344_v34, %v1320_v35 }
 0x203   : > { %v1086_v7 = vmax.f32 %v1083_v28, %v1084_v19  ;;  %v1352_v25 = vmax.f32 %v1349_v23, %v1350_v3 }
 0x204   : > { %v794_v22 = vadd.f32 %v2118_v18, %v760_v2 }
 0x206   : > { %v1053_v12 = vsel %vm1021_vm15, %v794_v22, -inf  ;;  %v1319_v52 = vsel %vm1287_vm1, %v794_v22, -inf }
 0x207   : > { %v1081_v9 = vmax.f32 %v2408_v55, %v1053_v12  ;;  %v1347_v40 = vmax.f32 %v1343_v33, %v1319_v52  ;;  %v831_v55 = vshrl.u32 %v830_v8, 7 }
 0x209   : > { %v1085_v45 = vmax.f32 %v1081_v9, %v1082_v44  ;;  %v1351_v18 = vmax.f32 %v1347_v40, %v1348_v13  ;;  %vm1095_vm3 = vcmp.eq.s32.totalorder %v831_v55, 0  ;;  %vm1361_vm4 = vcmp.eq.s32.totalorder %v831_v55, 1 }
 0x20b   : > { %v1087_v16 = vmax.f32 %v1085_v45, %v1086_v7  ;;  %v1353_v63 = vmax.f32 %v1351_v18, %v1352_v25 }
 0x20d   : > { %v1088_v49 = vrot.slane %v1087_v16, 4  ;;  %v1354_v4 = vrot.slane %v1353_v63, 4 }
 0x20f   : > { %v1089_v43 = vmax.f32 %v1087_v16, %v1088_v49  ;;  %v1355_v53 = vmax.f32 %v1353_v63, %v1354_v4 }
 0x211   : > { %v1090_v14 = vrot.slane %v1089_v43, 2  ;;  %v1356_v29 = vrot.slane %v1355_v53, 2 }
 0x213   : > { %v1091_v61 = vmax.f32 %v1089_v43, %v1090_v14  ;;  %v1357_v54 = vmax.f32 %v1355_v53, %v1356_v29 }
 0x215   : > { %v1092_v38 = vrot.slane %v1091_v61, 1  ;;  %v1358_v6 = vrot.slane %v1357_v54, 1 }
 0x217   : > { %v1093_v58 = vmax.f32 %v1091_v61, %v1092_v38  ;;  %v1359_v44 = vmax.f32 %v1357_v54, %v1358_v6 }
 0x219   : > { %v1094_v32 = vmax.f32 %v832_v1, %v1093_v58 }
 0x21b   : > { %v1098_v56 = vsel %vm1095_vm3, %v1094_v32, %v832_v1 }
 0x21c   : > { %v1360_v28 = vmax.f32 %v1098_v56, %v1359_v44 }
 0x21e   : > { %v1364_v42 = vsel %vm1361_vm4, %v1360_v28, %v1098_v56 }
 0x21f   : > { %1365 = vst [vmem:[%s1679_s7] sm:$0x3] %v1364_v42 }
 0x220 PF: > { %s15_s22 = sadd.s32 1, %s1612_s22   ;;  %s2506_s18 = smov %s1604_s20 }
 0x221   : > { %p12_p8 = scmp.ge.s32.totalorder %s15_s22, 6   ;;  %s2507_s19 = smov %s1608_s21 }
 0x222   : > { %s2508_s20 = smov %s2511_s23  ;;  %s2509_s21 = smov %s2515_s24 }
 0x223   :  { %14 = sbr.rel (!%p12_p8) target bundleno = 3 (0x3), region = 77 }

</bundles_post_ra>
